<compile_context>
chip_gen: v7x
topology: tpu7x:2x2x1
jax: 0.10.0
libtpu: 0.0.40
codegen_flags: <defaults>
</compile_context>

<pallas_src>
import functools

import jax
import jax.numpy as jnp
from jax import lax
from jax.experimental import pallas as pl
from jax.experimental.pallas import tpu as pltpu


def _encoder_kernel(xt_ref,                     # (S, Bp, F)   f32, time-major input
                    xf_ref,                     # (S*Bp, F)    f32, flat view of xt (batched attn1 matmul)
                    w1x_ref, w1s_ref, b1_ref,   # attn1: (F,T1) bf16, (2H,T1) bf16, (1,T1) f32
                    w2_ref, b2_ref,             # attn2: (T1,F) bf16, (1,F) f32
                    wg_ref, bg_ref,             # fused LSTM: (F+H,4H) bf16, cols [i|f|o|g]; (1,4H) f32
                    out_ref,                    # (S, Bp, 2H)  f32, columns [h | c]
                    xproj_ref):                 # VMEM scratch (S, Bp, T1) f32
    S, Bp, F = xt_ref.shape
    H = out_ref.shape[2] // 2
    T1 = b1_ref.shape[1]
    bf16, f32 = jnp.bfloat16, jnp.float32

    # ---- hoisted: weight loads + bias broadcasts (once, not per step) ----
    w1s = w1s_ref[...]                                   # (2H, T1)  bf16
    w2 = w2_ref[...]                                     # (T1, F)   bf16
    wg = wg_ref[...]                                     # (F+H, 4H) bf16
    b2 = jnp.broadcast_to(b2_ref[...], (Bp, F))          # (Bp, F)   f32
    bg = jnp.broadcast_to(bg_ref[...], (Bp, 4 * H))      # (Bp, 4H)  f32

    # ---- time-parallel part of attn1, pulled off the recurrent chain ----
    # One (S*Bp, F) @ (F, T1) matmul (full MXU sublane fill) replaces S tiny
    # per-step matmuls; bias b1 is folded in here so the step() adds nothing.
    proj = (jnp.dot(xf_ref[...].astype(bf16), w1x_ref[...],
                    preferred_element_type=f32)
            + jnp.broadcast_to(b1_ref[...], (S * Bp, T1)))           # (S*Bp, T1)
    for t in range(S):   # static, sublane-aligned (Bp % 8 == 0) vreg slices
        xproj_ref[t] = proj[t * Bp:(t + 1) * Bp, :]

    def step(t, hc):
        # hc: (Bp, 2H) f32, columns [h | c] (matches w1s row order).
        a = jnp.tanh(jnp.dot(hc.astype(bf16), w1s, preferred_element_type=f32)
                     + xproj_ref[t])                                 # (Bp, T1)
        x = xt_ref[t]                                                # (Bp, F) f32
        xi = (jnp.dot(a.astype(bf16), w2, preferred_element_type=f32) + b2) * x
        zi = jnp.concatenate([xi, hc[:, :H]], axis=-1).astype(bf16)  # (Bp, F+H)
        # Single fused gate matmul; column blocks ordered [i | f | o | g].
        gates = jnp.dot(zi, wg, preferred_element_type=f32) + bg     # (Bp, 4H)
        sg = jax.nn.sigmoid(gates[:, :3 * H])      # one contiguous 96-lane sigmoid
        gg = jnp.tanh(gates[:, 3 * H:])            # candidate gate, last 32 lanes
        c_new = sg[:, H:2 * H] * hc[:, H:] + sg[:, :H] * gg
        h_new = sg[:, 2 * H:] * jnp.tanh(c_new)
        hc_new = jnp.concatenate([h_new, c_new], axis=-1)            # (Bp, 2H)
        out_ref[t] = hc_new
        return hc_new

    # Short fixed trip count -> full unroll for LLO scheduler visibility.
    # TODO(synk): at production S use partial unroll (e.g. unroll=4) or the
    #             time-chunked grid so vreg live ranges stay bounded.
    lax.fori_loop(0, S, step, jnp.zeros((Bp, 2 * H), f32), unroll=True)


def _permute_gate_rows(w):
    """Reorder PyTorch LSTM gate blocks [i|f|g|o] -> [i|f|o|g] along axis 0."""
    i, f, g, o = jnp.split(w, 4, axis=0)
    return jnp.concatenate([i, f, o, g], axis=0)


def init_params(key, n_feat, n_hidden, T):
    """Deterministic synthetic parameters with the same shapes as the PyTorch module."""
    ks = jax.random.split(key, 8)
    s = 0.3
    return {
        "attn1_w":  s * jax.random.normal(ks[0], (T + 1, 2 * n_hidden + n_feat), jnp.float32),
        "attn1_b":  s * jax.random.normal(ks[1], (T + 1,), jnp.float32),
        "attn2_w":  s * jax.random.normal(ks[2], (n_feat, T + 1), jnp.float32),
        "attn2_b":  s * jax.random.normal(ks[3], (n_feat,), jnp.float32),
        "weight_ih": s * jax.random.normal(ks[4], (4 * n_hidden, n_feat), jnp.float32),
        "weight_hh": s * jax.random.normal(ks[5], (4 * n_hidden, n_hidden), jnp.float32),
        "bias_ih":  s * jax.random.normal(ks[6], (4 * n_hidden,), jnp.float32),
        "bias_hh":  s * jax.random.normal(ks[7], (4 * n_hidden,), jnp.float32),
    }


@functools.partial(jax.jit, static_argnames=("n_hidden", "T"))
def input_attn_encoder(X, params, *, n_hidden, T):
    """X: (B, seq, n_feat) float32.  Returns (hs, cs), each (B, seq, n_hidden)."""
    del T  # shapes are recovered from the parameter arrays
    B, S, F = X.shape
    H = n_hidden
    bf16, f32 = jnp.bfloat16, jnp.float32
    T1 = params["attn1_b"].shape[0]

    # --- parameter plumbing (plain JAX glue; runs once under jit) ---
    w1 = params["attn1_w"]                                  # (T1, F+2H), cat order [x, h, c]
    w1x = w1[:, :F].T.astype(bf16)                          # (F, T1)
    w1s = w1[:, F:].T.astype(bf16)                          # (2H, T1)  merged [h | c] part
    b1 = params["attn1_b"][None, :].astype(f32)             # (1, T1)
    w2 = params["attn2_w"].T.astype(bf16)                   # (T1, F)
    b2 = params["attn2_b"][None, :].astype(f32)             # (1, F)
    wih = _permute_gate_rows(params["weight_ih"])           # (4H, F), rows [i|f|o|g]
    whh = _permute_gate_rows(params["weight_hh"])           # (4H, H)
    wg = jnp.concatenate([wih, whh], axis=1).T.astype(bf16)  # (F+H, 4H) fused gate weight
    bg = _permute_gate_rows(params["bias_ih"]
                            + params["bias_hh"])[None, :].astype(f32)  # (1, 4H)

    # --- input layout: pad batch to a sublane multiple, go time-major ---
    Bp = ((B + 7) // 8) * 8
    Xp = jnp.pad(X, ((0, Bp - B), (0, 0), (0, 0)))          # zero rows never feed real rows
    Xt = jnp.transpose(Xp, (1, 0, 2)).astype(f32)           # (S, Bp, F)
    Xf = Xt.reshape(S * Bp, F)                              # flat view for the batched attn1 matmul

    vmem = lambda: pl.BlockSpec(memory_space=pltpu.MemorySpace.VMEM)
    out = pl.pallas_call(
        _encoder_kernel,
        out_shape=jax.ShapeDtypeStruct((S, Bp, 2 * H), f32),
        in_specs=[vmem() for _ in range(9)],
        out_specs=vmem(),
        scratch_shapes=[pltpu.VMEM((S, Bp, T1), f32)],
    )(Xt, Xf, w1x, w1s, b1, w2, b2, wg, bg)

    out = jnp.transpose(out, (1, 0, 2))[:B]                 # (B, S, 2H), drop batch padding
    return out[:, :, :H], out[:, :, H:]


def reference(X, params):
    """Pure-JAX (f32) replica of the PyTorch forward, for verification."""
    B, S, F = X.shape
    H = params["weight_hh"].shape[1]
    h = jnp.zeros((B, H), jnp.float32)
    c = jnp.zeros((B, H), jnp.float32)
    hs, cs = [], []
    for i in range(S):
        x = X[:, i, :]
        xi = jnp.concatenate([x, h, c], axis=1)
        a = jnp.tanh(xi @ params["attn1_w"].T + params["attn1_b"])
        xi2 = (a @ params["attn2_w"].T + params["attn2_b"]) * x
        gates = (xi2 @ params["weight_ih"].T + params["bias_ih"]
                 + h @ params["weight_hh"].T + params["bias_hh"])
        i_g, f_g, g_g, o_g = jnp.split(gates, 4, axis=1)
        c = jax.nn.sigmoid(f_g) * c + jax.nn.sigmoid(i_g) * jnp.tanh(g_g)
        h = jax.nn.sigmoid(o_g) * jnp.tanh(c)
        hs.append(h)
        cs.append(c)
    return jnp.stack(hs, axis=1), jnp.stack(cs, axis=1)


if __name__ == "__main__":
    B, n_feat, n_hidden, T = 2, 8, 32, 8
    seq_len = T  # module loops over X.size(1); use seq == T as in typical usage

    key = jax.random.PRNGKey(0)
    k_x, k_p = jax.random.split(key)
    X = jax.random.normal(k_x, (B, seq_len, n_feat), jnp.float32)
    params = init_params(k_p, n_feat, n_hidden, T)

    hs, cs = input_attn_encoder(X, params, n_hidden=n_hidden, T=T)
    jax.block_until_ready((hs, cs))

    hs_r, cs_r = reference(X, params)
    assert hs.shape == (B, seq_len, n_hidden) and cs.shape == (B, seq_len, n_hidden)
    # bf16 MXU operands with f32 state/accumulation -> loosened tolerance;
    # structural bugs would produce O(0.1-1) deviations.
    assert jnp.allclose(hs, hs_r, atol=1e-2, rtol=1e-2)
    assert jnp.allclose(cs, cs_r, atol=1e-2, rtol=1e-2)

    print("KERNEL_OK")
</pallas_src>

<mosaic_0001>
module attributes {stable_mosaic.version = 11 : i64} {
  func.func @_encoder_kernel(%arg0: memref<8x8x8xf32, #tpu.memory_space<vmem>>, %arg1: memref<64x8xf32, #tpu.memory_space<vmem>>, %arg2: memref<8x9xbf16, #tpu.memory_space<vmem>>, %arg3: memref<64x9xbf16, #tpu.memory_space<vmem>>, %arg4: memref<1x9xf32, #tpu.memory_space<vmem>>, %arg5: memref<9x8xbf16, #tpu.memory_space<vmem>>, %arg6: memref<1x8xf32, #tpu.memory_space<vmem>>, %arg7: memref<40x128xbf16, #tpu.memory_space<vmem>>, %arg8: memref<1x128xf32, #tpu.memory_space<vmem>>, %arg9: memref<8x8x64xf32, #tpu.memory_space<vmem>>, %arg10: memref<8x8x9xf32, #tpu.memory_space<vmem>>) attributes {dimension_semantics = [], scalar_prefetch = 0 : i64, scratch_operands = 1 : i64, tpu.core_type = #tpu.core_type<tc>} {
    %c0 = arith.constant 0 : index
    %c0_0 = arith.constant 0 : index
    %0 = vector.load %arg3[%c0, %c0_0] : memref<64x9xbf16, #tpu.memory_space<vmem>>, vector<64x9xbf16>
    %c0_1 = arith.constant 0 : index
    %c0_2 = arith.constant 0 : index
    %1 = vector.load %arg5[%c0_1, %c0_2] : memref<9x8xbf16, #tpu.memory_space<vmem>>, vector<9x8xbf16>
    %c0_3 = arith.constant 0 : index
    %c0_4 = arith.constant 0 : index
    %2 = vector.load %arg7[%c0_3, %c0_4] : memref<40x128xbf16, #tpu.memory_space<vmem>>, vector<40x128xbf16>
    %c0_5 = arith.constant 0 : index
    %c0_6 = arith.constant 0 : index
    %3 = vector.load %arg6[%c0_5, %c0_6] : memref<1x8xf32, #tpu.memory_space<vmem>>, vector<1x8xf32>
    %4 = vector.shape_cast %3 : vector<1x8xf32> to vector<1x8xf32>
    %5 = vector.broadcast %4 : vector<1x8xf32> to vector<8x8xf32>
    %c0_7 = arith.constant 0 : index
    %c0_8 = arith.constant 0 : index
    %6 = vector.load %arg8[%c0_7, %c0_8] : memref<1x128xf32, #tpu.memory_space<vmem>>, vector<1x128xf32>
    %7 = vector.shape_cast %6 : vector<1x128xf32> to vector<1x128xf32>
    %8 = vector.broadcast %7 : vector<1x128xf32> to vector<8x128xf32>
    %c0_9 = arith.constant 0 : index
    %c0_10 = arith.constant 0 : index
    %9 = vector.load %arg1[%c0_9, %c0_10] : memref<64x8xf32, #tpu.memory_space<vmem>>, vector<64x8xf32>
    %10 = arith.truncf %9 : vector<64x8xf32> to vector<64x8xbf16>
    %c0_11 = arith.constant 0 : index
    %c0_12 = arith.constant 0 : index
    %11 = vector.load %arg2[%c0_11, %c0_12] : memref<8x9xbf16, #tpu.memory_space<vmem>>, vector<8x9xbf16>
    %cst = arith.constant dense<0.000000e+00> : vector<64x9xf32>
    %12 = tpu.matmul %10, %11, %cst {dimension_numbers = #tpu.dot_dimension_numbers<[1], [0], [0], [1], [0, 0, 1, 1], [], []>} : vector<64x8xbf16>, vector<8x9xbf16>, vector<64x9xf32> -> vector<64x9xf32>
    %c0_13 = arith.constant 0 : index
    %c0_14 = arith.constant 0 : index
    %13 = vector.load %arg4[%c0_13, %c0_14] : memref<1x9xf32, #tpu.memory_space<vmem>>, vector<1x9xf32>
    %14 = vector.shape_cast %13 : vector<1x9xf32> to vector<1x9xf32>
    %15 = vector.broadcast %14 : vector<1x9xf32> to vector<64x9xf32>
    %16 = arith.addf %12, %15 : vector<64x9xf32>
    %17 = vector.extract_strided_slice %16 {offsets = [0, 0], sizes = [8, 9], strides = [1, 1]} : vector<64x9xf32> to vector<8x9xf32>
    %c0_15 = arith.constant 0 : index
    %c0_16 = arith.constant 0 : index
    %c0_17 = arith.constant 0 : index
    %18 = vector.load %arg10[%c0_15, %c0_16, %c0_17] : memref<8x8x9xf32, #tpu.memory_space<vmem>>, vector<1x8x9xf32>
    %19 = vector.shape_cast %18 : vector<1x8x9xf32> to vector<8x9xf32>
    %20 = vector.shape_cast %17 : vector<8x9xf32> to vector<1x8x9xf32>
    tpu.vector_store %arg10[%c0_15, %c0_16, %c0_17], %20 {strides = array<i32>} : memref<8x8x9xf32, #tpu.memory_space<vmem>>, vector<1x8x9xf32>,
    %21 = vector.extract_strided_slice %16 {offsets = [8, 0], sizes = [8, 9], strides = [1, 1]} : vector<64x9xf32> to vector<8x9xf32>
    %c1 = arith.constant 1 : index
    %c0_18 = arith.constant 0 : index
    %c0_19 = arith.constant 0 : index
    %22 = vector.load %arg10[%c1, %c0_18, %c0_19] : memref<8x8x9xf32, #tpu.memory_space<vmem>>, vector<1x8x9xf32>
    %23 = vector.shape_cast %22 : vector<1x8x9xf32> to vector<8x9xf32>
    %24 = vector.shape_cast %21 : vector<8x9xf32> to vector<1x8x9xf32>
    tpu.vector_store %arg10[%c1, %c0_18, %c0_19], %24 {strides = array<i32>} : memref<8x8x9xf32, #tpu.memory_space<vmem>>, vector<1x8x9xf32>,
    %25 = vector.extract_strided_slice %16 {offsets = [16, 0], sizes = [8, 9], strides = [1, 1]} : vector<64x9xf32> to vector<8x9xf32>
    %c2 = arith.constant 2 : index
    %c0_20 = arith.constant 0 : index
    %c0_21 = arith.constant 0 : index
    %26 = vector.load %arg10[%c2, %c0_20, %c0_21] : memref<8x8x9xf32, #tpu.memory_space<vmem>>, vector<1x8x9xf32>
    %27 = vector.shape_cast %26 : vector<1x8x9xf32> to vector<8x9xf32>
    %28 = vector.shape_cast %25 : vector<8x9xf32> to vector<1x8x9xf32>
    tpu.vector_store %arg10[%c2, %c0_20, %c0_21], %28 {strides = array<i32>} : memref<8x8x9xf32, #tpu.memory_space<vmem>>, vector<1x8x9xf32>,
    %29 = vector.extract_strided_slice %16 {offsets = [24, 0], sizes = [8, 9], strides = [1, 1]} : vector<64x9xf32> to vector<8x9xf32>
    %c3 = arith.constant 3 : index
    %c0_22 = arith.constant 0 : index
    %c0_23 = arith.constant 0 : index
    %30 = vector.load %arg10[%c3, %c0_22, %c0_23] : memref<8x8x9xf32, #tpu.memory_space<vmem>>, vector<1x8x9xf32>
    %31 = vector.shape_cast %30 : vector<1x8x9xf32> to vector<8x9xf32>
    %32 = vector.shape_cast %29 : vector<8x9xf32> to vector<1x8x9xf32>
    tpu.vector_store %arg10[%c3, %c0_22, %c0_23], %32 {strides = array<i32>} : memref<8x8x9xf32, #tpu.memory_space<vmem>>, vector<1x8x9xf32>,
    %33 = vector.extract_strided_slice %16 {offsets = [32, 0], sizes = [8, 9], strides = [1, 1]} : vector<64x9xf32> to vector<8x9xf32>
    %c4 = arith.constant 4 : index
    %c0_24 = arith.constant 0 : index
    %c0_25 = arith.constant 0 : index
    %34 = vector.load %arg10[%c4, %c0_24, %c0_25] : memref<8x8x9xf32, #tpu.memory_space<vmem>>, vector<1x8x9xf32>
    %35 = vector.shape_cast %34 : vector<1x8x9xf32> to vector<8x9xf32>
    %36 = vector.shape_cast %33 : vector<8x9xf32> to vector<1x8x9xf32>
    tpu.vector_store %arg10[%c4, %c0_24, %c0_25], %36 {strides = array<i32>} : memref<8x8x9xf32, #tpu.memory_space<vmem>>, vector<1x8x9xf32>,
    %37 = vector.extract_strided_slice %16 {offsets = [40, 0], sizes = [8, 9], strides = [1, 1]} : vector<64x9xf32> to vector<8x9xf32>
    %c5 = arith.constant 5 : index
    %c0_26 = arith.constant 0 : index
    %c0_27 = arith.constant 0 : index
    %38 = vector.load %arg10[%c5, %c0_26, %c0_27] : memref<8x8x9xf32, #tpu.memory_space<vmem>>, vector<1x8x9xf32>
    %39 = vector.shape_cast %38 : vector<1x8x9xf32> to vector<8x9xf32>
    %40 = vector.shape_cast %37 : vector<8x9xf32> to vector<1x8x9xf32>
    tpu.vector_store %arg10[%c5, %c0_26, %c0_27], %40 {strides = array<i32>} : memref<8x8x9xf32, #tpu.memory_space<vmem>>, vector<1x8x9xf32>,
    %41 = vector.extract_strided_slice %16 {offsets = [48, 0], sizes = [8, 9], strides = [1, 1]} : vector<64x9xf32> to vector<8x9xf32>
    %c6 = arith.constant 6 : index
    %c0_28 = arith.constant 0 : index
    %c0_29 = arith.constant 0 : index
    %42 = vector.load %arg10[%c6, %c0_28, %c0_29] : memref<8x8x9xf32, #tpu.memory_space<vmem>>, vector<1x8x9xf32>
    %43 = vector.shape_cast %42 : vector<1x8x9xf32> to vector<8x9xf32>
    %44 = vector.shape_cast %41 : vector<8x9xf32> to vector<1x8x9xf32>
    tpu.vector_store %arg10[%c6, %c0_28, %c0_29], %44 {strides = array<i32>} : memref<8x8x9xf32, #tpu.memory_space<vmem>>, vector<1x8x9xf32>,
    %45 = vector.extract_strided_slice %16 {offsets = [56, 0], sizes = [8, 9], strides = [1, 1]} : vector<64x9xf32> to vector<8x9xf32>
    %c7 = arith.constant 7 : index
    %c0_30 = arith.constant 0 : index
    %c0_31 = arith.constant 0 : index
    %46 = vector.load %arg10[%c7, %c0_30, %c0_31] : memref<8x8x9xf32, #tpu.memory_space<vmem>>, vector<1x8x9xf32>
    %47 = vector.shape_cast %46 : vector<1x8x9xf32> to vector<8x9xf32>
    %48 = vector.shape_cast %45 : vector<8x9xf32> to vector<1x8x9xf32>
    tpu.vector_store %arg10[%c7, %c0_30, %c0_31], %48 {strides = array<i32>} : memref<8x8x9xf32, #tpu.memory_space<vmem>>, vector<1x8x9xf32>,
    %cst_32 = arith.constant 0.000000e+00 : f32
    %49 = vector.broadcast %cst_32 : f32 to vector<8x64xf32>
    %c0_i32 = arith.constant 0 : i32
    %50 = arith.truncf %49 : vector<8x64xf32> to vector<8x64xbf16>
    %cst_33 = arith.constant dense<0.000000e+00> : vector<8x9xf32>
    %51 = tpu.matmul %50, %0, %cst_33 {dimension_numbers = #tpu.dot_dimension_numbers<[1], [0], [0], [1], [0, 0, 1, 1], [], []>} : vector<8x64xbf16>, vector<64x9xbf16>, vector<8x9xf32> -> vector<8x9xf32>
    %52 = arith.index_cast %c0_i32 : i32 to index
    %c0_34 = arith.constant 0 : index
    %c0_35 = arith.constant 0 : index
    %53 = vector.load %arg10[%52, %c0_34, %c0_35] : memref<8x8x9xf32, #tpu.memory_space<vmem>>, vector<1x8x9xf32>
    %54 = vector.shape_cast %53 : vector<1x8x9xf32> to vector<8x9xf32>
    %55 = arith.addf %51, %54 : vector<8x9xf32>
    %56 = math.tanh %55 : vector<8x9xf32>
    %57 = arith.index_cast %c0_i32 : i32 to index
    %c0_36 = arith.constant 0 : index
    %c0_37 = arith.constant 0 : index
    %58 = vector.load %arg0[%57, %c0_36, %c0_37] : memref<8x8x8xf32, #tpu.memory_space<vmem>>, vector<1x8x8xf32>
    %59 = vector.shape_cast %58 : vector<1x8x8xf32> to vector<8x8xf32>
    %60 = arith.truncf %56 : vector<8x9xf32> to vector<8x9xbf16>
    %cst_38 = arith.constant dense<0.000000e+00> : vector<8x8xf32>
    %61 = tpu.matmul %60, %1, %cst_38 {dimension_numbers = #tpu.dot_dimension_numbers<[1], [0], [0], [1], [0, 0, 1, 1], [], []>} : vector<8x9xbf16>, vector<9x8xbf16>, vector<8x8xf32> -> vector<8x8xf32>
    %62 = arith.addf %61, %5 : vector<8x8xf32>
    %63 = arith.mulf %62, %59 : vector<8x8xf32>
    %64 = vector.extract_strided_slice %49 {offsets = [0, 0], sizes = [8, 32], strides = [1, 1]} : vector<8x64xf32> to vector<8x32xf32>
    %65 = tpu.concatenate %63, %64 in 1 : vector<8x8xf32>, vector<8x32xf32> -> vector<8x40xf32>
    %66 = arith.truncf %65 : vector<8x40xf32> to vector<8x40xbf16>
    %cst_39 = arith.constant dense<0.000000e+00> : vector<8x128xf32>
    %67 = tpu.matmul %66, %2, %cst_39 {dimension_numbers = #tpu.dot_dimension_numbers<[1], [0], [0], [1], [0, 0, 1, 1], [], []>} : vector<8x40xbf16>, vector<40x128xbf16>, vector<8x128xf32> -> vector<8x128xf32>
    %68 = arith.addf %67, %8 : vector<8x128xf32>
    %69 = vector.extract_strided_slice %68 {offsets = [0, 0], sizes = [8, 96], strides = [1, 1]} : vector<8x128xf32> to vector<8x96xf32>
    %70 = arith.negf %69 : vector<8x96xf32>
    %71 = math.exp %70 : vector<8x96xf32>
    %cst_40 = arith.constant 1.000000e+00 : f32
    %72 = vector.broadcast %cst_40 : f32 to vector<8x96xf32>
    %73 = arith.addf %72, %71 : vector<8x96xf32>
    %74 = arith.divf %72, %73 : vector<8x96xf32>
    %75 = vector.extract_strided_slice %68 {offsets = [0, 96], sizes = [8, 32], strides = [1, 1]} : vector<8x128xf32> to vector<8x32xf32>
    %76 = math.tanh %75 : vector<8x32xf32>
    %77 = vector.extract_strided_slice %74 {offsets = [0, 32], sizes = [8, 32], strides = [1, 1]} : vector<8x96xf32> to vector<8x32xf32>
    %78 = vector.extract_strided_slice %49 {offsets = [0, 32], sizes = [8, 32], strides = [1, 1]} : vector<8x64xf32> to vector<8x32xf32>
    %79 = arith.mulf %77, %78 : vector<8x32xf32>
    %80 = vector.extract_strided_slice %74 {offsets = [0, 0], sizes = [8, 32], strides = [1, 1]} : vector<8x96xf32> to vector<8x32xf32>
    %81 = arith.mulf %80, %76 : vector<8x32xf32>
    %82 = arith.addf %79, %81 : vector<8x32xf32>
    %83 = vector.extract_strided_slice %74 {offsets = [0, 64], sizes = [8, 32], strides = [1, 1]} : vector<8x96xf32> to vector<8x32xf32>
    %84 = math.tanh %82 : vector<8x32xf32>
    %85 = arith.mulf %83, %84 : vector<8x32xf32>
    %86 = tpu.concatenate %85, %82 in 1 : vector<8x32xf32>, vector<8x32xf32> -> vector<8x64xf32>
    %87 = arith.index_cast %c0_i32 : i32 to index
    %c0_41 = arith.constant 0 : index
    %c0_42 = arith.constant 0 : index
    %88 = vector.load %arg9[%87, %c0_41, %c0_42] : memref<8x8x64xf32, #tpu.memory_space<vmem>>, vector<1x8x64xf32>
    %89 = vector.shape_cast %88 : vector<1x8x64xf32> to vector<8x64xf32>
    %90 = vector.shape_cast %86 : vector<8x64xf32> to vector<1x8x64xf32>
    tpu.vector_store %arg9[%87, %c0_41, %c0_42], %90 {strides = array<i32>} : memref<8x8x64xf32, #tpu.memory_space<vmem>>, vector<1x8x64xf32>,
    %c1_i32 = arith.constant 1 : i32
    %91 = arith.truncf %86 : vector<8x64xf32> to vector<8x64xbf16>
    %cst_43 = arith.constant dense<0.000000e+00> : vector<8x9xf32>
    %92 = tpu.matmul %91, %0, %cst_43 {dimension_numbers = #tpu.dot_dimension_numbers<[1], [0], [0], [1], [0, 0, 1, 1], [], []>} : vector<8x64xbf16>, vector<64x9xbf16>, vector<8x9xf32> -> vector<8x9xf32>
    %93 = arith.index_cast %c1_i32 : i32 to index
    %c0_44 = arith.constant 0 : index
    %c0_45 = arith.constant 0 : index
    %94 = vector.load %arg10[%93, %c0_44, %c0_45] : memref<8x8x9xf32, #tpu.memory_space<vmem>>, vector<1x8x9xf32>
    %95 = vector.shape_cast %94 : vector<1x8x9xf32> to vector<8x9xf32>
    %96 = arith.addf %92, %95 : vector<8x9xf32>
    %97 = math.tanh %96 : vector<8x9xf32>
    %98 = arith.index_cast %c1_i32 : i32 to index
    %c0_46 = arith.constant 0 : index
    %c0_47 = arith.constant 0 : index
    %99 = vector.load %arg0[%98, %c0_46, %c0_47] : memref<8x8x8xf32, #tpu.memory_space<vmem>>, vector<1x8x8xf32>
    %100 = vector.shape_cast %99 : vector<1x8x8xf32> to vector<8x8xf32>
    %101 = arith.truncf %97 : vector<8x9xf32> to vector<8x9xbf16>
    %cst_48 = arith.constant dense<0.000000e+00> : vector<8x8xf32>
    %102 = tpu.matmul %101, %1, %cst_48 {dimension_numbers = #tpu.dot_dimension_numbers<[1], [0], [0], [1], [0, 0, 1, 1], [], []>} : vector<8x9xbf16>, vector<9x8xbf16>, vector<8x8xf32> -> vector<8x8xf32>
    %103 = arith.addf %102, %5 : vector<8x8xf32>
    %104 = arith.mulf %103, %100 : vector<8x8xf32>
    %105 = vector.extract_strided_slice %86 {offsets = [0, 0], sizes = [8, 32], strides = [1, 1]} : vector<8x64xf32> to vector<8x32xf32>
    %106 = tpu.concatenate %104, %105 in 1 : vector<8x8xf32>, vector<8x32xf32> -> vector<8x40xf32>
    %107 = arith.truncf %106 : vector<8x40xf32> to vector<8x40xbf16>
    %cst_49 = arith.constant dense<0.000000e+00> : vector<8x128xf32>
    %108 = tpu.matmul %107, %2, %cst_49 {dimension_numbers = #tpu.dot_dimension_numbers<[1], [0], [0], [1], [0, 0, 1, 1], [], []>} : vector<8x40xbf16>, vector<40x128xbf16>, vector<8x128xf32> -> vector<8x128xf32>
    %109 = arith.addf %108, %8 : vector<8x128xf32>
    %110 = vector.extract_strided_slice %109 {offsets = [0, 0], sizes = [8, 96], strides = [1, 1]} : vector<8x128xf32> to vector<8x96xf32>
    %111 = arith.negf %110 : vector<8x96xf32>
    %112 = math.exp %111 : vector<8x96xf32>
    %cst_50 = arith.constant 1.000000e+00 : f32
    %113 = vector.broadcast %cst_50 : f32 to vector<8x96xf32>
    %114 = arith.addf %113, %112 : vector<8x96xf32>
    %115 = arith.divf %113, %114 : vector<8x96xf32>
    %116 = vector.extract_strided_slice %109 {offsets = [0, 96], sizes = [8, 32], strides = [1, 1]} : vector<8x128xf32> to vector<8x32xf32>
    %117 = math.tanh %116 : vector<8x32xf32>
    %118 = vector.extract_strided_slice %115 {offsets = [0, 32], sizes = [8, 32], strides = [1, 1]} : vector<8x96xf32> to vector<8x32xf32>
    %119 = vector.extract_strided_slice %86 {offsets = [0, 32], sizes = [8, 32], strides = [1, 1]} : vector<8x64xf32> to vector<8x32xf32>
    %120 = arith.mulf %118, %119 : vector<8x32xf32>
    %121 = vector.extract_strided_slice %115 {offsets = [0, 0], sizes = [8, 32], strides = [1, 1]} : vector<8x96xf32> to vector<8x32xf32>
    %122 = arith.mulf %121, %117 : vector<8x32xf32>
    %123 = arith.addf %120, %122 : vector<8x32xf32>
    %124 = vector.extract_strided_slice %115 {offsets = [0, 64], sizes = [8, 32], strides = [1, 1]} : vector<8x96xf32> to vector<8x32xf32>
    %125 = math.tanh %123 : vector<8x32xf32>
    %126 = arith.mulf %124, %125 : vector<8x32xf32>
    %127 = tpu.concatenate %126, %123 in 1 : vector<8x32xf32>, vector<8x32xf32> -> vector<8x64xf32>
    %128 = arith.index_cast %c1_i32 : i32 to index
    %c0_51 = arith.constant 0 : index
    %c0_52 = arith.constant 0 : index
    %129 = vector.load %arg9[%128, %c0_51, %c0_52] : memref<8x8x64xf32, #tpu.memory_space<vmem>>, vector<1x8x64xf32>
    %130 = vector.shape_cast %129 : vector<1x8x64xf32> to vector<8x64xf32>
    %131 = vector.shape_cast %127 : vector<8x64xf32> to vector<1x8x64xf32>
    tpu.vector_store %arg9[%128, %c0_51, %c0_52], %131 {strides = array<i32>} : memref<8x8x64xf32, #tpu.memory_space<vmem>>, vector<1x8x64xf32>,
    %c2_i32 = arith.constant 2 : i32
    %132 = arith.truncf %127 : vector<8x64xf32> to vector<8x64xbf16>
    %cst_53 = arith.constant dense<0.000000e+00> : vector<8x9xf32>
    %133 = tpu.matmul %132, %0, %cst_53 {dimension_numbers = #tpu.dot_dimension_numbers<[1], [0], [0], [1], [0, 0, 1, 1], [], []>} : vector<8x64xbf16>, vector<64x9xbf16>, vector<8x9xf32> -> vector<8x9xf32>
    %134 = arith.index_cast %c2_i32 : i32 to index
    %c0_54 = arith.constant 0 : index
    %c0_55 = arith.constant 0 : index
    %135 = vector.load %arg10[%134, %c0_54, %c0_55] : memref<8x8x9xf32, #tpu.memory_space<vmem>>, vector<1x8x9xf32>
    %136 = vector.shape_cast %135 : vector<1x8x9xf32> to vector<8x9xf32>
    %137 = arith.addf %133, %136 : vector<8x9xf32>
    %138 = math.tanh %137 : vector<8x9xf32>
    %139 = arith.index_cast %c2_i32 : i32 to index
    %c0_56 = arith.constant 0 : index
    %c0_57 = arith.constant 0 : index
    %140 = vector.load %arg0[%139, %c0_56, %c0_57] : memref<8x8x8xf32, #tpu.memory_space<vmem>>, vector<1x8x8xf32>
    %141 = vector.shape_cast %140 : vector<1x8x8xf32> to vector<8x8xf32>
    %142 = arith.truncf %138 : vector<8x9xf32> to vector<8x9xbf16>
    %cst_58 = arith.constant dense<0.000000e+00> : vector<8x8xf32>
    %143 = tpu.matmul %142, %1, %cst_58 {dimension_numbers = #tpu.dot_dimension_numbers<[1], [0], [0], [1], [0, 0, 1, 1], [], []>} : vector<8x9xbf16>, vector<9x8xbf16>, vector<8x8xf32> -> vector<8x8xf32>
    %144 = arith.addf %143, %5 : vector<8x8xf32>
    %145 = arith.mulf %144, %141 : vector<8x8xf32>
    %146 = vector.extract_strided_slice %127 {offsets = [0, 0], sizes = [8, 32], strides = [1, 1]} : vector<8x64xf32> to vector<8x32xf32>
    %147 = tpu.concatenate %145, %146 in 1 : vector<8x8xf32>, vector<8x32xf32> -> vector<8x40xf32>
    %148 = arith.truncf %147 : vector<8x40xf32> to vector<8x40xbf16>
    %cst_59 = arith.constant dense<0.000000e+00> : vector<8x128xf32>
    %149 = tpu.matmul %148, %2, %cst_59 {dimension_numbers = #tpu.dot_dimension_numbers<[1], [0], [0], [1], [0, 0, 1, 1], [], []>} : vector<8x40xbf16>, vector<40x128xbf16>, vector<8x128xf32> -> vector<8x128xf32>
    %150 = arith.addf %149, %8 : vector<8x128xf32>
    %151 = vector.extract_strided_slice %150 {offsets = [0, 0], sizes = [8, 96], strides = [1, 1]} : vector<8x128xf32> to vector<8x96xf32>
    %152 = arith.negf %151 : vector<8x96xf32>
    %153 = math.exp %152 : vector<8x96xf32>
    %cst_60 = arith.constant 1.000000e+00 : f32
    %154 = vector.broadcast %cst_60 : f32 to vector<8x96xf32>
    %155 = arith.addf %154, %153 : vector<8x96xf32>
    %156 = arith.divf %154, %155 : vector<8x96xf32>
    %157 = vector.extract_strided_slice %150 {offsets = [0, 96], sizes = [8, 32], strides = [1, 1]} : vector<8x128xf32> to vector<8x32xf32>
    %158 = math.tanh %157 : vector<8x32xf32>
    %159 = vector.extract_strided_slice %156 {offsets = [0, 32], sizes = [8, 32], strides = [1, 1]} : vector<8x96xf32> to vector<8x32xf32>
    %160 = vector.extract_strided_slice %127 {offsets = [0, 32], sizes = [8, 32], strides = [1, 1]} : vector<8x64xf32> to vector<8x32xf32>
    %161 = arith.mulf %159, %160 : vector<8x32xf32>
    %162 = vector.extract_strided_slice %156 {offsets = [0, 0], sizes = [8, 32], strides = [1, 1]} : vector<8x96xf32> to vector<8x32xf32>
    %163 = arith.mulf %162, %158 : vector<8x32xf32>
    %164 = arith.addf %161, %163 : vector<8x32xf32>
    %165 = vector.extract_strided_slice %156 {offsets = [0, 64], sizes = [8, 32], strides = [1, 1]} : vector<8x96xf32> to vector<8x32xf32>
    %166 = math.tanh %164 : vector<8x32xf32>
    %167 = arith.mulf %165, %166 : vector<8x32xf32>
    %168 = tpu.concatenate %167, %164 in 1 : vector<8x32xf32>, vector<8x32xf32> -> vector<8x64xf32>
    %169 = arith.index_cast %c2_i32 : i32 to index
    %c0_61 = arith.constant 0 : index
    %c0_62 = arith.constant 0 : index
    %170 = vector.load %arg9[%169, %c0_61, %c0_62] : memref<8x8x64xf32, #tpu.memory_space<vmem>>, vector<1x8x64xf32>
    %171 = vector.shape_cast %170 : vector<1x8x64xf32> to vector<8x64xf32>
    %172 = vector.shape_cast %168 : vector<8x64xf32> to vector<1x8x64xf32>
    tpu.vector_store %arg9[%169, %c0_61, %c0_62], %172 {strides = array<i32>} : memref<8x8x64xf32, #tpu.memory_space<vmem>>, vector<1x8x64xf32>,
    %c3_i32 = arith.constant 3 : i32
    %173 = arith.truncf %168 : vector<8x64xf32> to vector<8x64xbf16>
    %cst_63 = arith.constant dense<0.000000e+00> : vector<8x9xf32>
    %174 = tpu.matmul %173, %0, %cst_63 {dimension_numbers = #tpu.dot_dimension_numbers<[1], [0], [0], [1], [0, 0, 1, 1], [], []>} : vector<8x64xbf16>, vector<64x9xbf16>, vector<8x9xf32> -> vector<8x9xf32>
    %175 = arith.index_cast %c3_i32 : i32 to index
    %c0_64 = arith.constant 0 : index
    %c0_65 = arith.constant 0 : index
    %176 = vector.load %arg10[%175, %c0_64, %c0_65] : memref<8x8x9xf32, #tpu.memory_space<vmem>>, vector<1x8x9xf32>
    %177 = vector.shape_cast %176 : vector<1x8x9xf32> to vector<8x9xf32>
    %178 = arith.addf %174, %177 : vector<8x9xf32>
    %179 = math.tanh %178 : vector<8x9xf32>
    %180 = arith.index_cast %c3_i32 : i32 to index
    %c0_66 = arith.constant 0 : index
    %c0_67 = arith.constant 0 : index
    %181 = vector.load %arg0[%180, %c0_66, %c0_67] : memref<8x8x8xf32, #tpu.memory_space<vmem>>, vector<1x8x8xf32>
    %182 = vector.shape_cast %181 : vector<1x8x8xf32> to vector<8x8xf32>
    %183 = arith.truncf %179 : vector<8x9xf32> to vector<8x9xbf16>
    %cst_68 = arith.constant dense<0.000000e+00> : vector<8x8xf32>
    %184 = tpu.matmul %183, %1, %cst_68 {dimension_numbers = #tpu.dot_dimension_numbers<[1], [0], [0], [1], [0, 0, 1, 1], [], []>} : vector<8x9xbf16>, vector<9x8xbf16>, vector<8x8xf32> -> vector<8x8xf32>
    %185 = arith.addf %184, %5 : vector<8x8xf32>
    %186 = arith.mulf %185, %182 : vector<8x8xf32>
    %187 = vector.extract_strided_slice %168 {offsets = [0, 0], sizes = [8, 32], strides = [1, 1]} : vector<8x64xf32> to vector<8x32xf32>
    %188 = tpu.concatenate %186, %187 in 1 : vector<8x8xf32>, vector<8x32xf32> -> vector<8x40xf32>
    %189 = arith.truncf %188 : vector<8x40xf32> to vector<8x40xbf16>
    %cst_69 = arith.constant dense<0.000000e+00> : vector<8x128xf32>
    %190 = tpu.matmul %189, %2, %cst_69 {dimension_numbers = #tpu.dot_dimension_numbers<[1], [0], [0], [1], [0, 0, 1, 1], [], []>} : vector<8x40xbf16>, vector<40x128xbf16>, vector<8x128xf32> -> vector<8x128xf32>
    %191 = arith.addf %190, %8 : vector<8x128xf32>
    %192 = vector.extract_strided_slice %191 {offsets = [0, 0], sizes = [8, 96], strides = [1, 1]} : vector<8x128xf32> to vector<8x96xf32>
    %193 = arith.negf %192 : vector<8x96xf32>
    %194 = math.exp %193 : vector<8x96xf32>
    %cst_70 = arith.constant 1.000000e+00 : f32
    %195 = vector.broadcast %cst_70 : f32 to vector<8x96xf32>
    %196 = arith.addf %195, %194 : vector<8x96xf32>
    %197 = arith.divf %195, %196 : vector<8x96xf32>
    %198 = vector.extract_strided_slice %191 {offsets = [0, 96], sizes = [8, 32], strides = [1, 1]} : vector<8x128xf32> to vector<8x32xf32>
    %199 = math.tanh %198 : vector<8x32xf32>
    %200 = vector.extract_strided_slice %197 {offsets = [0, 32], sizes = [8, 32], strides = [1, 1]} : vector<8x96xf32> to vector<8x32xf32>
    %201 = vector.extract_strided_slice %168 {offsets = [0, 32], sizes = [8, 32], strides = [1, 1]} : vector<8x64xf32> to vector<8x32xf32>
    %202 = arith.mulf %200, %201 : vector<8x32xf32>
    %203 = vector.extract_strided_slice %197 {offsets = [0, 0], sizes = [8, 32], strides = [1, 1]} : vector<8x96xf32> to vector<8x32xf32>
    %204 = arith.mulf %203, %199 : vector<8x32xf32>
    %205 = arith.addf %202, %204 : vector<8x32xf32>
    %206 = vector.extract_strided_slice %197 {offsets = [0, 64], sizes = [8, 32], strides = [1, 1]} : vector<8x96xf32> to vector<8x32xf32>
    %207 = math.tanh %205 : vector<8x32xf32>
    %208 = arith.mulf %206, %207 : vector<8x32xf32>
    %209 = tpu.concatenate %208, %205 in 1 : vector<8x32xf32>, vector<8x32xf32> -> vector<8x64xf32>
    %210 = arith.index_cast %c3_i32 : i32 to index
    %c0_71 = arith.constant 0 : index
    %c0_72 = arith.constant 0 : index
    %211 = vector.load %arg9[%210, %c0_71, %c0_72] : memref<8x8x64xf32, #tpu.memory_space<vmem>>, vector<1x8x64xf32>
    %212 = vector.shape_cast %211 : vector<1x8x64xf32> to vector<8x64xf32>
    %213 = vector.shape_cast %209 : vector<8x64xf32> to vector<1x8x64xf32>
    tpu.vector_store %arg9[%210, %c0_71, %c0_72], %213 {strides = array<i32>} : memref<8x8x64xf32, #tpu.memory_space<vmem>>, vector<1x8x64xf32>,
    %c4_i32 = arith.constant 4 : i32
    %214 = arith.truncf %209 : vector<8x64xf32> to vector<8x64xbf16>
    %cst_73 = arith.constant dense<0.000000e+00> : vector<8x9xf32>
    %215 = tpu.matmul %214, %0, %cst_73 {dimension_numbers = #tpu.dot_dimension_numbers<[1], [0], [0], [1], [0, 0, 1, 1], [], []>} : vector<8x64xbf16>, vector<64x9xbf16>, vector<8x9xf32> -> vector<8x9xf32>
    %216 = arith.index_cast %c4_i32 : i32 to index
    %c0_74 = arith.constant 0 : index
    %c0_75 = arith.constant 0 : index
    %217 = vector.load %arg10[%216, %c0_74, %c0_75] : memref<8x8x9xf32, #tpu.memory_space<vmem>>, vector<1x8x9xf32>
    %218 = vector.shape_cast %217 : vector<1x8x9xf32> to vector<8x9xf32>
    %219 = arith.addf %215, %218 : vector<8x9xf32>
    %220 = math.tanh %219 : vector<8x9xf32>
    %221 = arith.index_cast %c4_i32 : i32 to index
    %c0_76 = arith.constant 0 : index
    %c0_77 = arith.constant 0 : index
    %222 = vector.load %arg0[%221, %c0_76, %c0_77] : memref<8x8x8xf32, #tpu.memory_space<vmem>>, vector<1x8x8xf32>
    %223 = vector.shape_cast %222 : vector<1x8x8xf32> to vector<8x8xf32>
    %224 = arith.truncf %220 : vector<8x9xf32> to vector<8x9xbf16>
    %cst_78 = arith.constant dense<0.000000e+00> : vector<8x8xf32>
    %225 = tpu.matmul %224, %1, %cst_78 {dimension_numbers = #tpu.dot_dimension_numbers<[1], [0], [0], [1], [0, 0, 1, 1], [], []>} : vector<8x9xbf16>, vector<9x8xbf16>, vector<8x8xf32> -> vector<8x8xf32>
    %226 = arith.addf %225, %5 : vector<8x8xf32>
    %227 = arith.mulf %226, %223 : vector<8x8xf32>
    %228 = vector.extract_strided_slice %209 {offsets = [0, 0], sizes = [8, 32], strides = [1, 1]} : vector<8x64xf32> to vector<8x32xf32>
    %229 = tpu.concatenate %227, %228 in 1 : vector<8x8xf32>, vector<8x32xf32> -> vector<8x40xf32>
    %230 = arith.truncf %229 : vector<8x40xf32> to vector<8x40xbf16>
    %cst_79 = arith.constant dense<0.000000e+00> : vector<8x128xf32>
    %231 = tpu.matmul %230, %2, %cst_79 {dimension_numbers = #tpu.dot_dimension_numbers<[1], [0], [0], [1], [0, 0, 1, 1], [], []>} : vector<8x40xbf16>, vector<40x128xbf16>, vector<8x128xf32> -> vector<8x128xf32>
    %232 = arith.addf %231, %8 : vector<8x128xf32>
    %233 = vector.extract_strided_slice %232 {offsets = [0, 0], sizes = [8, 96], strides = [1, 1]} : vector<8x128xf32> to vector<8x96xf32>
    %234 = arith.negf %233 : vector<8x96xf32>
    %235 = math.exp %234 : vector<8x96xf32>
    %cst_80 = arith.constant 1.000000e+00 : f32
    %236 = vector.broadcast %cst_80 : f32 to vector<8x96xf32>
    %237 = arith.addf %236, %235 : vector<8x96xf32>
    %238 = arith.divf %236, %237 : vector<8x96xf32>
    %239 = vector.extract_strided_slice %232 {offsets = [0, 96], sizes = [8, 32], strides = [1, 1]} : vector<8x128xf32> to vector<8x32xf32>
    %240 = math.tanh %239 : vector<8x32xf32>
    %241 = vector.extract_strided_slice %238 {offsets = [0, 32], sizes = [8, 32], strides = [1, 1]} : vector<8x96xf32> to vector<8x32xf32>
    %242 = vector.extract_strided_slice %209 {offsets = [0, 32], sizes = [8, 32], strides = [1, 1]} : vector<8x64xf32> to vector<8x32xf32>
    %243 = arith.mulf %241, %242 : vector<8x32xf32>
    %244 = vector.extract_strided_slice %238 {offsets = [0, 0], sizes = [8, 32], strides = [1, 1]} : vector<8x96xf32> to vector<8x32xf32>
    %245 = arith.mulf %244, %240 : vector<8x32xf32>
    %246 = arith.addf %243, %245 : vector<8x32xf32>
    %247 = vector.extract_strided_slice %238 {offsets = [0, 64], sizes = [8, 32], strides = [1, 1]} : vector<8x96xf32> to vector<8x32xf32>
    %248 = math.tanh %246 : vector<8x32xf32>
    %249 = arith.mulf %247, %248 : vector<8x32xf32>
    %250 = tpu.concatenate %249, %246 in 1 : vector<8x32xf32>, vector<8x32xf32> -> vector<8x64xf32>
    %251 = arith.index_cast %c4_i32 : i32 to index
    %c0_81 = arith.constant 0 : index
    %c0_82 = arith.constant 0 : index
    %252 = vector.load %arg9[%251, %c0_81, %c0_82] : memref<8x8x64xf32, #tpu.memory_space<vmem>>, vector<1x8x64xf32>
    %253 = vector.shape_cast %252 : vector<1x8x64xf32> to vector<8x64xf32>
    %254 = vector.shape_cast %250 : vector<8x64xf32> to vector<1x8x64xf32>
    tpu.vector_store %arg9[%251, %c0_81, %c0_82], %254 {strides = array<i32>} : memref<8x8x64xf32, #tpu.memory_space<vmem>>, vector<1x8x64xf32>,
    %c5_i32 = arith.constant 5 : i32
    %255 = arith.truncf %250 : vector<8x64xf32> to vector<8x64xbf16>
    %cst_83 = arith.constant dense<0.000000e+00> : vector<8x9xf32>
    %256 = tpu.matmul %255, %0, %cst_83 {dimension_numbers = #tpu.dot_dimension_numbers<[1], [0], [0], [1], [0, 0, 1, 1], [], []>} : vector<8x64xbf16>, vector<64x9xbf16>, vector<8x9xf32> -> vector<8x9xf32>
    %257 = arith.index_cast %c5_i32 : i32 to index
    %c0_84 = arith.constant 0 : index
    %c0_85 = arith.constant 0 : index
    %258 = vector.load %arg10[%257, %c0_84, %c0_85] : memref<8x8x9xf32, #tpu.memory_space<vmem>>, vector<1x8x9xf32>
    %259 = vector.shape_cast %258 : vector<1x8x9xf32> to vector<8x9xf32>
    %260 = arith.addf %256, %259 : vector<8x9xf32>
    %261 = math.tanh %260 : vector<8x9xf32>
    %262 = arith.index_cast %c5_i32 : i32 to index
    %c0_86 = arith.constant 0 : index
    %c0_87 = arith.constant 0 : index
    %263 = vector.load %arg0[%262, %c0_86, %c0_87] : memref<8x8x8xf32, #tpu.memory_space<vmem>>, vector<1x8x8xf32>
    %264 = vector.shape_cast %263 : vector<1x8x8xf32> to vector<8x8xf32>
    %265 = arith.truncf %261 : vector<8x9xf32> to vector<8x9xbf16>
    %cst_88 = arith.constant dense<0.000000e+00> : vector<8x8xf32>
    %266 = tpu.matmul %265, %1, %cst_88 {dimension_numbers = #tpu.dot_dimension_numbers<[1], [0], [0], [1], [0, 0, 1, 1], [], []>} : vector<8x9xbf16>, vector<9x8xbf16>, vector<8x8xf32> -> vector<8x8xf32>
    %267 = arith.addf %266, %5 : vector<8x8xf32>
    %268 = arith.mulf %267, %264 : vector<8x8xf32>
    %269 = vector.extract_strided_slice %250 {offsets = [0, 0], sizes = [8, 32], strides = [1, 1]} : vector<8x64xf32> to vector<8x32xf32>
    %270 = tpu.concatenate %268, %269 in 1 : vector<8x8xf32>, vector<8x32xf32> -> vector<8x40xf32>
    %271 = arith.truncf %270 : vector<8x40xf32> to vector<8x40xbf16>
    %cst_89 = arith.constant dense<0.000000e+00> : vector<8x128xf32>
    %272 = tpu.matmul %271, %2, %cst_89 {dimension_numbers = #tpu.dot_dimension_numbers<[1], [0], [0], [1], [0, 0, 1, 1], [], []>} : vector<8x40xbf16>, vector<40x128xbf16>, vector<8x128xf32> -> vector<8x128xf32>
    %273 = arith.addf %272, %8 : vector<8x128xf32>
    %274 = vector.extract_strided_slice %273 {offsets = [0, 0], sizes = [8, 96], strides = [1, 1]} : vector<8x128xf32> to vector<8x96xf32>
    %275 = arith.negf %274 : vector<8x96xf32>
    %276 = math.exp %275 : vector<8x96xf32>
    %cst_90 = arith.constant 1.000000e+00 : f32
    %277 = vector.broadcast %cst_90 : f32 to vector<8x96xf32>
    %278 = arith.addf %277, %276 : vector<8x96xf32>
    %279 = arith.divf %277, %278 : vector<8x96xf32>
    %280 = vector.extract_strided_slice %273 {offsets = [0, 96], sizes = [8, 32], strides = [1, 1]} : vector<8x128xf32> to vector<8x32xf32>
    %281 = math.tanh %280 : vector<8x32xf32>
    %282 = vector.extract_strided_slice %279 {offsets = [0, 32], sizes = [8, 32], strides = [1, 1]} : vector<8x96xf32> to vector<8x32xf32>
    %283 = vector.extract_strided_slice %250 {offsets = [0, 32], sizes = [8, 32], strides = [1, 1]} : vector<8x64xf32> to vector<8x32xf32>
    %284 = arith.mulf %282, %283 : vector<8x32xf32>
    %285 = vector.extract_strided_slice %279 {offsets = [0, 0], sizes = [8, 32], strides = [1, 1]} : vector<8x96xf32> to vector<8x32xf32>
    %286 = arith.mulf %285, %281 : vector<8x32xf32>
    %287 = arith.addf %284, %286 : vector<8x32xf32>
    %288 = vector.extract_strided_slice %279 {offsets = [0, 64], sizes = [8, 32], strides = [1, 1]} : vector<8x96xf32> to vector<8x32xf32>
    %289 = math.tanh %287 : vector<8x32xf32>
    %290 = arith.mulf %288, %289 : vector<8x32xf32>
    %291 = tpu.concatenate %290, %287 in 1 : vector<8x32xf32>, vector<8x32xf32> -> vector<8x64xf32>
    %292 = arith.index_cast %c5_i32 : i32 to index
    %c0_91 = arith.constant 0 : index
    %c0_92 = arith.constant 0 : index
    %293 = vector.load %arg9[%292, %c0_91, %c0_92] : memref<8x8x64xf32, #tpu.memory_space<vmem>>, vector<1x8x64xf32>
    %294 = vector.shape_cast %293 : vector<1x8x64xf32> to vector<8x64xf32>
    %295 = vector.shape_cast %291 : vector<8x64xf32> to vector<1x8x64xf32>
    tpu.vector_store %arg9[%292, %c0_91, %c0_92], %295 {strides = array<i32>} : memref<8x8x64xf32, #tpu.memory_space<vmem>>, vector<1x8x64xf32>,
    %c6_i32 = arith.constant 6 : i32
    %296 = arith.truncf %291 : vector<8x64xf32> to vector<8x64xbf16>
    %cst_93 = arith.constant dense<0.000000e+00> : vector<8x9xf32>
    %297 = tpu.matmul %296, %0, %cst_93 {dimension_numbers = #tpu.dot_dimension_numbers<[1], [0], [0], [1], [0, 0, 1, 1], [], []>} : vector<8x64xbf16>, vector<64x9xbf16>, vector<8x9xf32> -> vector<8x9xf32>
    %298 = arith.index_cast %c6_i32 : i32 to index
    %c0_94 = arith.constant 0 : index
    %c0_95 = arith.constant 0 : index
    %299 = vector.load %arg10[%298, %c0_94, %c0_95] : memref<8x8x9xf32, #tpu.memory_space<vmem>>, vector<1x8x9xf32>
    %300 = vector.shape_cast %299 : vector<1x8x9xf32> to vector<8x9xf32>
    %301 = arith.addf %297, %300 : vector<8x9xf32>
    %302 = math.tanh %301 : vector<8x9xf32>
    %303 = arith.index_cast %c6_i32 : i32 to index
    %c0_96 = arith.constant 0 : index
    %c0_97 = arith.constant 0 : index
    %304 = vector.load %arg0[%303, %c0_96, %c0_97] : memref<8x8x8xf32, #tpu.memory_space<vmem>>, vector<1x8x8xf32>
    %305 = vector.shape_cast %304 : vector<1x8x8xf32> to vector<8x8xf32>
    %306 = arith.truncf %302 : vector<8x9xf32> to vector<8x9xbf16>
    %cst_98 = arith.constant dense<0.000000e+00> : vector<8x8xf32>
    %307 = tpu.matmul %306, %1, %cst_98 {dimension_numbers = #tpu.dot_dimension_numbers<[1], [0], [0], [1], [0, 0, 1, 1], [], []>} : vector<8x9xbf16>, vector<9x8xbf16>, vector<8x8xf32> -> vector<8x8xf32>
    %308 = arith.addf %307, %5 : vector<8x8xf32>
    %309 = arith.mulf %308, %305 : vector<8x8xf32>
    %310 = vector.extract_strided_slice %291 {offsets = [0, 0], sizes = [8, 32], strides = [1, 1]} : vector<8x64xf32> to vector<8x32xf32>
    %311 = tpu.concatenate %309, %310 in 1 : vector<8x8xf32>, vector<8x32xf32> -> vector<8x40xf32>
    %312 = arith.truncf %311 : vector<8x40xf32> to vector<8x40xbf16>
    %cst_99 = arith.constant dense<0.000000e+00> : vector<8x128xf32>
    %313 = tpu.matmul %312, %2, %cst_99 {dimension_numbers = #tpu.dot_dimension_numbers<[1], [0], [0], [1], [0, 0, 1, 1], [], []>} : vector<8x40xbf16>, vector<40x128xbf16>, vector<8x128xf32> -> vector<8x128xf32>
    %314 = arith.addf %313, %8 : vector<8x128xf32>
    %315 = vector.extract_strided_slice %314 {offsets = [0, 0], sizes = [8, 96], strides = [1, 1]} : vector<8x128xf32> to vector<8x96xf32>
    %316 = arith.negf %315 : vector<8x96xf32>
    %317 = math.exp %316 : vector<8x96xf32>
    %cst_100 = arith.constant 1.000000e+00 : f32
    %318 = vector.broadcast %cst_100 : f32 to vector<8x96xf32>
    %319 = arith.addf %318, %317 : vector<8x96xf32>
    %320 = arith.divf %318, %319 : vector<8x96xf32>
    %321 = vector.extract_strided_slice %314 {offsets = [0, 96], sizes = [8, 32], strides = [1, 1]} : vector<8x128xf32> to vector<8x32xf32>
    %322 = math.tanh %321 : vector<8x32xf32>
    %323 = vector.extract_strided_slice %320 {offsets = [0, 32], sizes = [8, 32], strides = [1, 1]} : vector<8x96xf32> to vector<8x32xf32>
    %324 = vector.extract_strided_slice %291 {offsets = [0, 32], sizes = [8, 32], strides = [1, 1]} : vector<8x64xf32> to vector<8x32xf32>
    %325 = arith.mulf %323, %324 : vector<8x32xf32>
    %326 = vector.extract_strided_slice %320 {offsets = [0, 0], sizes = [8, 32], strides = [1, 1]} : vector<8x96xf32> to vector<8x32xf32>
    %327 = arith.mulf %326, %322 : vector<8x32xf32>
    %328 = arith.addf %325, %327 : vector<8x32xf32>
    %329 = vector.extract_strided_slice %320 {offsets = [0, 64], sizes = [8, 32], strides = [1, 1]} : vector<8x96xf32> to vector<8x32xf32>
    %330 = math.tanh %328 : vector<8x32xf32>
    %331 = arith.mulf %329, %330 : vector<8x32xf32>
    %332 = tpu.concatenate %331, %328 in 1 : vector<8x32xf32>, vector<8x32xf32> -> vector<8x64xf32>
    %333 = arith.index_cast %c6_i32 : i32 to index
    %c0_101 = arith.constant 0 : index
    %c0_102 = arith.constant 0 : index
    %334 = vector.load %arg9[%333, %c0_101, %c0_102] : memref<8x8x64xf32, #tpu.memory_space<vmem>>, vector<1x8x64xf32>
    %335 = vector.shape_cast %334 : vector<1x8x64xf32> to vector<8x64xf32>
    %336 = vector.shape_cast %332 : vector<8x64xf32> to vector<1x8x64xf32>
    tpu.vector_store %arg9[%333, %c0_101, %c0_102], %336 {strides = array<i32>} : memref<8x8x64xf32, #tpu.memory_space<vmem>>, vector<1x8x64xf32>,
    %c7_i32 = arith.constant 7 : i32
    %337 = arith.truncf %332 : vector<8x64xf32> to vector<8x64xbf16>
    %cst_103 = arith.constant dense<0.000000e+00> : vector<8x9xf32>
    %338 = tpu.matmul %337, %0, %cst_103 {dimension_numbers = #tpu.dot_dimension_numbers<[1], [0], [0], [1], [0, 0, 1, 1], [], []>} : vector<8x64xbf16>, vector<64x9xbf16>, vector<8x9xf32> -> vector<8x9xf32>
    %339 = arith.index_cast %c7_i32 : i32 to index
    %c0_104 = arith.constant 0 : index
    %c0_105 = arith.constant 0 : index
    %340 = vector.load %arg10[%339, %c0_104, %c0_105] : memref<8x8x9xf32, #tpu.memory_space<vmem>>, vector<1x8x9xf32>
    %341 = vector.shape_cast %340 : vector<1x8x9xf32> to vector<8x9xf32>
    %342 = arith.addf %338, %341 : vector<8x9xf32>
    %343 = math.tanh %342 : vector<8x9xf32>
    %344 = arith.index_cast %c7_i32 : i32 to index
    %c0_106 = arith.constant 0 : index
    %c0_107 = arith.constant 0 : index
    %345 = vector.load %arg0[%344, %c0_106, %c0_107] : memref<8x8x8xf32, #tpu.memory_space<vmem>>, vector<1x8x8xf32>
    %346 = vector.shape_cast %345 : vector<1x8x8xf32> to vector<8x8xf32>
    %347 = arith.truncf %343 : vector<8x9xf32> to vector<8x9xbf16>
    %cst_108 = arith.constant dense<0.000000e+00> : vector<8x8xf32>
    %348 = tpu.matmul %347, %1, %cst_108 {dimension_numbers = #tpu.dot_dimension_numbers<[1], [0], [0], [1], [0, 0, 1, 1], [], []>} : vector<8x9xbf16>, vector<9x8xbf16>, vector<8x8xf32> -> vector<8x8xf32>
    %349 = arith.addf %348, %5 : vector<8x8xf32>
    %350 = arith.mulf %349, %346 : vector<8x8xf32>
    %351 = vector.extract_strided_slice %332 {offsets = [0, 0], sizes = [8, 32], strides = [1, 1]} : vector<8x64xf32> to vector<8x32xf32>
    %352 = tpu.concatenate %350, %351 in 1 : vector<8x8xf32>, vector<8x32xf32> -> vector<8x40xf32>
    %353 = arith.truncf %352 : vector<8x40xf32> to vector<8x40xbf16>
    %cst_109 = arith.constant dense<0.000000e+00> : vector<8x128xf32>
    %354 = tpu.matmul %353, %2, %cst_109 {dimension_numbers = #tpu.dot_dimension_numbers<[1], [0], [0], [1], [0, 0, 1, 1], [], []>} : vector<8x40xbf16>, vector<40x128xbf16>, vector<8x128xf32> -> vector<8x128xf32>
    %355 = arith.addf %354, %8 : vector<8x128xf32>
    %356 = vector.extract_strided_slice %355 {offsets = [0, 0], sizes = [8, 96], strides = [1, 1]} : vector<8x128xf32> to vector<8x96xf32>
    %357 = arith.negf %356 : vector<8x96xf32>
    %358 = math.exp %357 : vector<8x96xf32>
    %cst_110 = arith.constant 1.000000e+00 : f32
    %359 = vector.broadcast %cst_110 : f32 to vector<8x96xf32>
    %360 = arith.addf %359, %358 : vector<8x96xf32>
    %361 = arith.divf %359, %360 : vector<8x96xf32>
    %362 = vector.extract_strided_slice %355 {offsets = [0, 96], sizes = [8, 32], strides = [1, 1]} : vector<8x128xf32> to vector<8x32xf32>
    %363 = math.tanh %362 : vector<8x32xf32>
    %364 = vector.extract_strided_slice %361 {offsets = [0, 32], sizes = [8, 32], strides = [1, 1]} : vector<8x96xf32> to vector<8x32xf32>
    %365 = vector.extract_strided_slice %332 {offsets = [0, 32], sizes = [8, 32], strides = [1, 1]} : vector<8x64xf32> to vector<8x32xf32>
    %366 = arith.mulf %364, %365 : vector<8x32xf32>
    %367 = vector.extract_strided_slice %361 {offsets = [0, 0], sizes = [8, 32], strides = [1, 1]} : vector<8x96xf32> to vector<8x32xf32>
    %368 = arith.mulf %367, %363 : vector<8x32xf32>
    %369 = arith.addf %366, %368 : vector<8x32xf32>
    %370 = vector.extract_strided_slice %361 {offsets = [0, 64], sizes = [8, 32], strides = [1, 1]} : vector<8x96xf32> to vector<8x32xf32>
    %371 = math.tanh %369 : vector<8x32xf32>
    %372 = arith.mulf %370, %371 : vector<8x32xf32>
    %373 = tpu.concatenate %372, %369 in 1 : vector<8x32xf32>, vector<8x32xf32> -> vector<8x64xf32>
    %374 = arith.index_cast %c7_i32 : i32 to index
    %c0_111 = arith.constant 0 : index
    %c0_112 = arith.constant 0 : index
    %375 = vector.load %arg9[%374, %c0_111, %c0_112] : memref<8x8x64xf32, #tpu.memory_space<vmem>>, vector<1x8x64xf32>
    %376 = vector.shape_cast %375 : vector<1x8x64xf32> to vector<8x64xf32>
    %377 = vector.shape_cast %373 : vector<8x64xf32> to vector<1x8x64xf32>
    tpu.vector_store %arg9[%374, %c0_111, %c0_112], %377 {strides = array<i32>} : memref<8x8x64xf32, #tpu.memory_space<vmem>>, vector<1x8x64xf32>,
    %c8_i32 = arith.constant 8 : i32
    return
  }
}

</mosaic_0001>

<bundles_post_ra>
// kernel: input_attn_encoder.1
= control target key start
LH: loop header
LB: loop body
LE: loop exit
PB: predicated region body
PF: predicated region fallthrough
CT: control target
= control target key end

     0   :  { %vm95_vm0 = vcmask 1043456   ;;  %vm260_vm1 = vcmask 1044480   ;;  %v2104_v2 = vmov 65535   ;;  %vm82_vm2 = vcmask 64512   ;;  %s2108_s23 = smov 32   ;;  %s2110_s26 = smov 8   ;;  %s2605_s2 = inlined_call_operand.vmem [shape: bf16[8,9], index: 2, kind: input, shape index: {}]   ;;  %s2606_s5 = inlined_call_operand.vmem [shape: bf16[9,8], index: 5, kind: input, shape index: {}]   ;;  %s2607_s7 = inlined_call_operand.vmem [shape: bf16[40,128], index: 7, kind: input, shape index: {}]   ;;  %s2608_s1 = inlined_call_operand.vmem [shape: f32[64,8], index: 1, kind: input, shape index: {}]   ;;  %s2609_s3 = inlined_call_operand.vmem [shape: bf16[64,9], index: 3, kind: input, shape index: {}]   ;;  %s2610_s4 = inlined_call_operand.vmem [shape: f32[1,9], index: 4, kind: input, shape index: {}]   ;;  %s2611_s6 = inlined_call_operand.vmem [shape: f32[1,8], index: 6, kind: input, shape index: {}]   ;;  %s2612_s0 = inlined_call_operand.vmem [shape: f32[8,8,8], index: 0, kind: input, shape index: {}]   ;;  %s2613_s8 = inlined_call_operand.vmem [shape: f32[1,128], index: 8, kind: input, shape index: {}]   ;;  %s2614_s9 = inlined_call_operand.vmem [shape: f32[8,8,64], index: 9, kind: output, shape index: {}]  }
   0x1   :  { %v74_v0 = vld [vmem:[%s2605_s2] sm:$0xf]  ;;  %v261_v3 = vsel %vm95_vm0, 4294967295, %v2104_v2  ;;  %v63_v7 = vld [vmem:[%s2608_s1 + $0x8] sm:$0xff]  ;;  %v64_v8 = vld [vmem:[%s2608_s1 + $0x10] sm:$0xff]  ;;  %v2105_v12 = vmov 0.0  }
   0x2   :  { %v2012_v1 = vld [vmem:[%s2606_s5] sm:$0x1f]   ;;  %2004 = vmatprep.subr.msk.bf16.mxu1 %vm95_vm0, %v74_v0  ;;  %v97_v4 = vsel %vm95_vm0, %v74_v0, 0  ;;  %v262_v5 = vsel %vm260_vm1, %v261_v3, 0  ;;  %v65_v11 = vld [vmem:[%s2608_s1 + $0x18] sm:$0xff]  ;;  %1792 = vmatprep.subr.bf16.mxu0 %v2105_v12  ;;  %vm2106_vm3 = vmmov 0  }
   0x3   :  { %1771 = vmatpush3.bf16.msra.mxu1 %v97_v4  ;;  %v62_v6 = vld [vmem:[%s2608_s1] sm:$0xff]  ;;  %v2179_v9 = vand.u32 %v2012_v1, %v262_v5  ;;  %v71_v13 = vpack.c.bf16 %v65_v11, %v64_v8  ;;  %1794 = vmatprep.mubr.msk.bf16.mxu0 %vm2106_vm3, %v2105_v12  ;;  %v67_v16 = vld [vmem:[%s2608_s1 + $0x28] sm:$0xff]  ;;  %v68_v19 = vld [vmem:[%s2608_s1 + $0x30] sm:$0xff]  ;;  %v2107_v25 = vmov 0   ;;  %vm164_vm4 = vcmask 72704  }
   0x4   :  { %v70_v10 = vpack.c.bf16 %v63_v7, %v62_v6  ;;  %1780 = vmatprep.subr.bf16.mxu1 %v2105_v12  ;;  %v2189_v14 = vld [vmem:[%s2609_s3] sm:$0xff]   ;;  %v2205_v17 = vld [vmem:[%s2609_s3 + $0x8] sm:$0xff]   ;;  %v69_v20 = vld [vmem:[%s2608_s1 + $0x38] sm:$0xff]  ;;  %vm324_vm5 = vcmask 326656   ;;  %vm399_vm6 = vcmask 261120   ;;  %vm205_vm7 = vcmask 523264  }
   0x5   :  { %v66_v15 = vld [vmem:[%s2608_s1 + $0x20] sm:$0xff]  ;;  %1793 = vmatpush3.bf16.msra.mxu0 %v2179_v9  ;;  %v73_v21 = vpack.c.bf16 %v69_v20, %v68_v19  ;;  %v2221_v22 = vld [vmem:[%s2609_s3 + $0x10] sm:$0xff]   ;;  %v2229_v23 = vld [vmem:[%s2609_s3 + $0x18] sm:$0xff]  }
   0x6   :  { %1772 = vmatprep.mubr.msk.bf16.mxu1 %vm82_vm2, %v70_v10  ;;  %v72_v18 = vpack.c.bf16 %v67_v16, %v66_v15  ;;  %1808 = vmatprep.subr.bf16.mxu0 %v2105_v12  ;;  %v2237_v24 = vld [vmem:[%s2607_s7] sm:$0xff]   ;;  %v2244_v26 = vld [vmem:[%s2607_s7 + $0x8] sm:$0xff]   ;;  %v2015_v27 = vld [vmem:[%s2607_s7 + $0x10] ss:$0 sps:$4 sm:$0xff]  }
   0x7   :  { %1773 = vmatmul.mubr.msk.bf16.vlgmr.msra.gmra.mrb[0].mxu1 %vm82_vm2, %v71_v13  ;;  %v2255_v28 = vsel %vm95_vm0, %v2015_v27, 0  ;;  %v1619_v29 = vld [vmem:[%s2610_s4] ss:$0 sm:$0xff] }
   0x8   :  { %1781 = vmatpush3.bf16.msra.mxu1 %v2189_v14  ;;  %1776 = vmatprep.mubr.msk.bf16.mxu1 %vm82_vm2, %v72_v18  ;;  %v2285_v54 = vld [vmem:[%s2611_s6] ss:$0 sm:$0xff] }
   0x9   :  { %1782 = vmatprep.subr.bf16.mxu1 %v2105_v12  ;;  %v250_v55 = vld [vmem:[%s2612_s0] sm:$0xff] }
   0xa   :  { %v2300_v0 = vld [vmem:[%s2613_s8] ss:$0 sm:$0xff]  ;;  %s2109_s8 = smov 64  }
   0xc   :  { %1783 = vmatpush3.bf16.msra.mxu1 %v2205_v17 }
   0xd   :  { %1784 = vmatprep.subr.bf16.mxu1 %v2105_v12 }
   0xf   :  { %1777 = vmatmul.mubr.msk.bf16.gmra.mrb[4].mxu1 %vm82_vm2, %v73_v21 }
  0x10   :  { %1785 = vmatpush3.bf16.msra.mxu1 %v2221_v22  ;;  %1788 = vmatprep.mubr.msk.bf16.mxu1 %vm2106_vm3, %v2105_v12 }
  0x11   :  { %1786 = vmatprep.subr.bf16.mxu1 %v2105_v12 }
  0x14   :  { %1787 = vmatpush3.bf16.msra.mxu1 %v2229_v23 }
  0x15   :  { %1798 = vmatprep.subr.bf16.mxu1 %v2105_v12 }
  0x17   :  { %1789 = vmatmul.mubr.bf16.vlgmr.msra.gmra.mrb[8].mxu1 %v2107_v25 }
  0x18   :  { %1799 = vmatpush3.bf16.msra.mxu1 %v2237_v24  ;;  %1804 = vmatprep.mubr.msk.bf16.mxu1 %vm2106_vm3, %v2105_v12 }
  0x19   :  { %1800 = vmatprep.subr.bf16.mxu1 %v2105_v12 }
  0x1c   :  { %1801 = vmatpush3.bf16.msra.mxu1 %v2244_v26 }
  0x1d   :  { %1802 = vmatprep.subr.bf16.mxu1 %v2105_v12 }
  0x20   :  { %1803 = vmatpush3.bf16.msra.mxu1 %v2255_v28 }
  0x21   :  { %1820 = vmatprep.subr.bf16.mxu1 %v2105_v12 }
  0xda   :  { %v1774_v30 = vpop.f32.mrb[0].mxu1 }
  0xdb   :  { %v142_v31 = vadd.f32 %v1774_v30, %v1619_v29  ;;  %v133_v32 = vpop.f32.mrb[1].mxu1 }
  0xdc   :  { %v134_v33 = vadd.f32 %v1619_v29, %v133_v32  ;;  %v1775_v34 = vpop.f32.mrb[2].mxu1 }
  0xdd   :  { %169 = vst.msk [vmem:[#allocation2 + $0x10] sm:$0xff] %vm164_vm4, %v142_v31  ;;  %v145_v35 = vadd.f32 %v1775_v34, %v1619_v29  ;;  %v136_v36 = vpop.f32.mrb[3].mxu1 }
  0xde   :  { %165 = vst.msk [vmem:[#allocation2] sm:$0xff] %vm164_vm4, %v134_v33  ;;  %v137_v37 = vadd.f32 %v1619_v29, %v136_v36 }
  0xdf   :  { %171 = vst.msk [vmem:[#allocation2 + $0x18] sm:$0xff] %vm164_vm4, %v145_v35 }
  0xe0   :  { %167 = vst.msk [vmem:[#allocation2 + $0x8] sm:$0xff] %vm164_vm4, %v137_v37 }
  0xe2   :  { %v1778_v38 = vpop.f32.mrb[4].mxu1 }
  0xe3   :  { %v158_v39 = vadd.f32 %v1778_v38, %v1619_v29  ;;  %v149_v40 = vpop.f32.mrb[5].mxu1 }
  0xe4   :  { %v150_v41 = vadd.f32 %v1619_v29, %v149_v40  ;;  %v1779_v42 = vpop.f32.mrb[6].mxu1 }
  0xe5   :  { %177 = vst.msk [vmem:[#allocation2 + $0x30] sm:$0xff] %vm164_vm4, %v158_v39  ;;  %v161_v43 = vadd.f32 %v1779_v42, %v1619_v29  ;;  %v152_v44 = vpop.f32.mrb[7].mxu1  ;;  %v180_v46 = vld [vmem:[#allocation2] sm:$0xff]  ;;  %v1636_v39 = vld [vmem:[%s2612_s0 + $0x8] sm:$0xff] }
  0xe6   :  { %173 = vst.msk [vmem:[#allocation2 + $0x20] sm:$0xff] %vm164_vm4, %v150_v41  ;;  %v153_v45 = vadd.f32 %v1619_v29, %v152_v44 }
  0xe7   :  { %179 = vst.msk [vmem:[#allocation2 + $0x38] sm:$0xff] %vm164_vm4, %v161_v43  ;;  %v403_v31 = vld [vmem:[#allocation2 + $0x8] sm:$0xff] }
  0xe8   :  { %175 = vst.msk [vmem:[#allocation2 + $0x28] sm:$0xff] %vm164_vm4, %v153_v45 }
  0xea   :  { %v243_v47 = vpop.f32.mrb[8].mxu1 }
  0xeb   :  { %v244_v48 = vadd.f32 %v243_v47, %v180_v46  ;;  %v1790_v49 = vpop.f32.mrb[9].mxu1 }
  0xec   :  { %v246_v50 = vpop.f32.mrb[10].mxu1 }
  0xed   :  { %2020 = vtanh.f32 %v244_v48  ;;  %v1791_v51 = vpop.f32.mrb[11].mxu1 }
  0xf7   :  { %v2021_v52 = vpop.eup %2020 }
  0xf8   :  { %v251_v53 = vpack.c.bf16 %v2021_v52, %v2021_v52 }
  0xfa   :  { %1795 = vmatmul.mubr.msk.bf16.vlgmr.msra.gmra.mrb[0].mxu0 %vm164_vm4, %v251_v53 }
  0xfb   :  { %1809 = vmatpush3.bf16.msra.mxu0 %v2189_v14  ;;  %1816 = vmatprep.mubr.msk.bf16.mxu0 %vm2106_vm3, %v2105_v12 }
  0xfc   :  { %1810 = vmatprep.subr.bf16.mxu0 %v2105_v12 }
  0xff   :  { %1811 = vmatpush3.bf16.msra.mxu0 %v2205_v17 }
 0x100   :  { %1812 = vmatprep.subr.bf16.mxu0 %v2105_v12 }
 0x103   :  { %1813 = vmatpush3.bf16.msra.mxu0 %v2221_v22 }
 0x104   :  { %1814 = vmatprep.subr.bf16.mxu0 %v2105_v12 }
 0x107   :  { %1815 = vmatpush3.bf16.msra.mxu0 %v2229_v23 }
 0x108   :  { %1826 = vmatprep.subr.bf16.mxu0 %v2105_v12 }
 0x1cd   :  { %v300_v56 = vpop.f32.mrb[0].mxu0 }
 0x1ce   :  { %v301_v57 = vadd.f32 %v2285_v54, %v300_v56  ;;  %v1796_v58 = vpop.f32.mrb[1].mxu0 }
 0x1cf   :  { %v303_v59 = vpop.f32.mrb[2].mxu0 }
 0x1d0   :  { %v306_v60 = vmul.f32 %v301_v57, %v250_v55  ;;  %v1797_v61 = vpop.f32.mrb[3].mxu0 }
 0x1d2   :  { %v307_v62 = vsel %vm82_vm2, %v306_v60, 0.0 }
 0x1d3   :  { %v308_v63 = vpack.c.bf16 %v307_v62, %v307_v62 }
 0x1d5   :  { %1805 = vmatmul.mubr.msk.bf16.vlgmr.msra.gmra.mrb[12].mxu1 %vm324_vm5, %v308_v63 }
 0x1d6   :  { %1821 = vmatpush3.bf16.msra.mxu1 %v2179_v9  ;;  %1822 = vmatprep.mubr.msk.bf16.mxu1 %vm2106_vm3, %v2105_v12 }
 0x1d7   :  { %1836 = vmatprep.subr.bf16.mxu1 %v2105_v12 }
 0x2a8   :  { %v365_v1 = vpop.f32.mrb[12].mxu1 }
 0x2a9   :  { %v366_v2 = vadd.f32 %v2300_v0, %v365_v1  ;;  %v1806_v3 = vpop.f32.mrb[13].mxu1 }
 0x2aa   :  { %v368_v4 = vpop.f32.mrb[14].mxu1 }
 0x2ab   :  { %2022 = vtanh.f32 %v366_v2  ;;  %v1807_v5 = vpop.f32.mrb[15].mxu1  ;;  %v1634_v7 = vmul.f32 -1.442695, %v366_v2 }
 0x2ad   :  { %2024 = vpow2.f32 %v1634_v7 }
 0x2b5   :  { %v2023_v6 = vpop.eup %2022 }
 0x2b6   :  { %380 = vrot.lane.b32.xlu0 %v2023_v6, %s2108_s23 }
 0x2b7   :  { %v2025_v8 = vpop.eup %2024 }
 0x2b8   :  { %v374_v10 = vadd.f32 1.0, %v2025_v8  ;;  %v576_v8 = vld [vmem:[#allocation2 + $0x10] sm:$0xff] }
 0x2ba   :  { %2026 = vrcp.f32 %v374_v10 }
 0x2c4   :  { %v2027_v11 = vpop.eup %2026 }
 0x2c5   :  { %v378_v16 = vmul.f32 0.0, %v2027_v11 }
 0x328   :  { %v381_v13 = vpop.permute.xlu0 %380 }
 0x329   :  { %v383_v15 = vmul.f32 %v2027_v11, %v381_v13 }
 0x32b   :  { %385 = vrot.lane.b32.xlu0 %v383_v15, %s2108_s23 }
 0x39d   :  { %v386_v18 = vpop.permute.xlu0 %385 }
 0x39e   :  { %v388_v19 = vadd.f32 %v386_v18, %v378_v16 }
 0x3a0   :  { %2028 = vtanh.f32 %v388_v19 }
 0x3aa   :  { %v2029_v20 = vpop.eup %2028 }
 0x3ab   :  { %391 = vrot.lane.b32.xlu1 %v2029_v20, %s2108_s23  ;;  %v1642_v20 = vld [vmem:[%s2612_s0 + $0x10] sm:$0xff] }
 0x41d   :  { %v392_v21 = vpop.permute.xlu1 %391 }
 0x41e   :  { %v394_v25 = vmul.f32 %v2027_v11, %v392_v21 }
 0x420   :  { %396 = vrot.lane.b32.xlu1 %v394_v25, %s2109_s8 }
 0x492   :  { %v397_v27 = vpop.permute.xlu1 %396 }
 0x493   :  { %v2308_v29 = vsel %vm399_vm6, %v397_v27, %v388_v19 }
 0x494   :  { %401 = vst.msk [vmem:[%s2614_s9] sm:$0xff] %vm205_vm7, %v2308_v29  ;;  %v402_v30 = vpack.c.bf16 %v2308_v29, %v2308_v29  ;;  %496 = vrot.lane.b32.xlu0 %v2308_v29, %s2110_s26 }
 0x496   :  { %1817 = vmatmul.mubr.msk.bf16.vlgmr.msra.gmra.mrb[4].mxu0 %vm205_vm7, %v402_v30 }
 0x497   :  { %1827 = vmatpush3.bf16.msra.mxu0 %v2237_v24  ;;  %1832 = vmatprep.mubr.msk.bf16.mxu0 %vm2106_vm3, %v2105_v12 }
 0x498   :  { %1828 = vmatprep.subr.bf16.mxu0 %v2105_v12 }
 0x49b   :  { %1829 = vmatpush3.bf16.msra.mxu0 %v2244_v26 }
 0x49c   :  { %1830 = vmatprep.subr.bf16.mxu0 %v2105_v12 }
 0x49f   :  { %1831 = vmatpush3.bf16.msra.mxu0 %v2255_v28 }
 0x4a0   :  { %1848 = vmatprep.subr.bf16.mxu0 %v2105_v12 }
 0x506   :  { %v497_v46 = vpop.permute.xlu0 %496 }
 0x569   :  { %v441_v32 = vpop.f32.mrb[4].mxu0 }
 0x56a   :  { %v442_v33 = vadd.f32 %v441_v32, %v403_v31  ;;  %v1818_v34 = vpop.f32.mrb[5].mxu0 }
 0x56b   :  { %v444_v35 = vpop.f32.mrb[6].mxu0 }
 0x56c   :  { %2030 = vtanh.f32 %v442_v33  ;;  %v1819_v36 = vpop.f32.mrb[7].mxu0 }
 0x576   :  { %v2031_v37 = vpop.eup %2030 }
 0x577   :  { %v450_v38 = vpack.c.bf16 %v2031_v37, %v2031_v37 }
 0x579   :  { %1823 = vmatmul.mubr.msk.bf16.vlgmr.msra.gmra.mrb[16].mxu1 %vm164_vm4, %v450_v38 }
 0x57a   :  { %1837 = vmatpush3.bf16.msra.mxu1 %v2189_v14  ;;  %1844 = vmatprep.mubr.msk.bf16.mxu1 %vm2106_vm3, %v2105_v12 }
 0x57b   :  { %1838 = vmatprep.subr.bf16.mxu1 %v2105_v12 }
 0x57e   :  { %1839 = vmatpush3.bf16.msra.mxu1 %v2205_v17 }
 0x57f   :  { %1840 = vmatprep.subr.bf16.mxu1 %v2105_v12 }
 0x582   :  { %1841 = vmatpush3.bf16.msra.mxu1 %v2221_v22 }
 0x583   :  { %1842 = vmatprep.subr.bf16.mxu1 %v2105_v12 }
 0x586   :  { %1843 = vmatpush3.bf16.msra.mxu1 %v2229_v23 }
 0x587   :  { %1854 = vmatprep.subr.bf16.mxu1 %v2105_v12 }
 0x64c   :  { %v488_v40 = vpop.f32.mrb[16].mxu1 }
 0x64d   :  { %v489_v41 = vadd.f32 %v2285_v54, %v488_v40  ;;  %v1824_v42 = vpop.f32.mrb[17].mxu1 }
 0x64e   :  { %v491_v43 = vpop.f32.mrb[18].mxu1 }
 0x64f   :  { %v494_v44 = vmul.f32 %v1636_v39, %v489_v41  ;;  %v1825_v45 = vpop.f32.mrb[19].mxu1 }
 0x651   :  { %v499_v47 = vsel %vm82_vm2, %v494_v44, %v497_v46 }
 0x652   :  { %v500_v48 = vpack.c.bf16 %v499_v47, %v499_v47 }
 0x654   :  { %1833 = vmatmul.mubr.msk.bf16.vlgmr.msra.gmra.mrb[8].mxu0 %vm324_vm5, %v500_v48 }
 0x655   :  { %1849 = vmatpush3.bf16.msra.mxu0 %v2179_v9  ;;  %1850 = vmatprep.mubr.msk.bf16.mxu0 %vm2106_vm3, %v2105_v12 }
 0x656   :  { %1864 = vmatprep.subr.bf16.mxu0 %v2105_v12 }
 0x727   :  { %v538_v49 = vpop.f32.mrb[8].mxu0 }
 0x728   :  { %v539_v50 = vadd.f32 %v2300_v0, %v538_v49  ;;  %v1834_v51 = vpop.f32.mrb[9].mxu0 }
 0x729   :  { %v541_v52 = vpop.f32.mrb[10].mxu0 }
 0x72a   :  { %2032 = vtanh.f32 %v539_v50  ;;  %v1835_v53 = vpop.f32.mrb[11].mxu0  ;;  %v1639_v56 = vmul.f32 -1.442695, %v539_v50 }
 0x72c   :  { %2034 = vpow2.f32 %v1639_v56 }
 0x734   :  { %v2033_v55 = vpop.eup %2032 }
 0x735   :  { %553 = vrot.lane.b32.xlu1 %v2033_v55, %s2108_s23 }
 0x736   :  { %v2035_v57 = vpop.eup %2034 }
 0x737   :  { %v547_v58 = vadd.f32 1.0, %v2035_v57  ;;  %v749_v57 = vld [vmem:[#allocation2 + $0x18] sm:$0xff] }
 0x739   :  { %2036 = vrcp.f32 %v547_v58 }
 0x743   :  { %v2037_v59 = vpop.eup %2036 }
 0x744   :  { %v551_v62 = vmul.f32 %v2037_v59, %v2308_v29 }
 0x7a7   :  { %v554_v60 = vpop.permute.xlu1 %553 }
 0x7a8   :  { %v556_v61 = vmul.f32 %v2037_v59, %v554_v60 }
 0x7aa   :  { %558 = vrot.lane.b32.xlu0 %v556_v61, %s2108_s23 }
 0x81c   :  { %v559_v63 = vpop.permute.xlu0 %558 }
 0x81d   :  { %v561_v1 = vadd.f32 %v559_v63, %v551_v62 }
 0x81f   :  { %2038 = vtanh.f32 %v561_v1 }
 0x829   :  { %v2039_v2 = vpop.eup %2038 }
 0x82a   :  { %564 = vrot.lane.b32.xlu1 %v2039_v2, %s2108_s23  ;;  %v1648_v2 = vld [vmem:[%s2612_s0 + $0x18] sm:$0xff] }
 0x89c   :  { %v565_v3 = vpop.permute.xlu1 %564 }
 0x89d   :  { %v567_v4 = vmul.f32 %v2037_v59, %v565_v3 }
 0x89f   :  { %569 = vrot.lane.b32.xlu0 %v567_v4, %s2109_s8 }
 0x911   :  { %v570_v5 = vpop.permute.xlu0 %569 }
 0x912   :  { %v572_v6 = vsel %vm399_vm6, %v570_v5, %v561_v1 }
 0x913   :  { %1640 = vst.msk [vmem:[%s2614_s9 + $0x8] sm:$0xff] %vm205_vm7, %v572_v6  ;;  %v575_v7 = vpack.c.bf16 %v572_v6, %v572_v6  ;;  %669 = vrot.lane.b32.xlu1 %v572_v6, %s2110_s26 }
 0x915   :  { %1845 = vmatmul.mubr.msk.bf16.vlgmr.msra.gmra.mrb[20].mxu1 %vm205_vm7, %v575_v7 }
 0x916   :  { %1855 = vmatpush3.bf16.msra.mxu1 %v2237_v24  ;;  %1860 = vmatprep.mubr.msk.bf16.mxu1 %vm2106_vm3, %v2105_v12 }
 0x917   :  { %1856 = vmatprep.subr.bf16.mxu1 %v2105_v12 }
 0x91a   :  { %1857 = vmatpush3.bf16.msra.mxu1 %v2244_v26 }
 0x91b   :  { %1858 = vmatprep.subr.bf16.mxu1 %v2105_v12 }
 0x91e   :  { %1859 = vmatpush3.bf16.msra.mxu1 %v2255_v28 }
 0x91f   :  { %1876 = vmatprep.subr.bf16.mxu1 %v2105_v12 }
 0x985   :  { %v670_v32 = vpop.permute.xlu1 %669 }
 0x9e8   :  { %v614_v10 = vpop.f32.mrb[20].mxu1 }
 0x9e9   :  { %v615_v11 = vadd.f32 %v614_v10, %v576_v8  ;;  %v1846_v13 = vpop.f32.mrb[21].mxu1 }
 0x9ea   :  { %v617_v15 = vpop.f32.mrb[22].mxu1 }
 0x9eb   :  { %2040 = vtanh.f32 %v615_v11  ;;  %v1847_v16 = vpop.f32.mrb[23].mxu1 }
 0x9f5   :  { %v2041_v18 = vpop.eup %2040 }
 0x9f6   :  { %v623_v19 = vpack.c.bf16 %v2041_v18, %v2041_v18 }
 0x9f8   :  { %1851 = vmatmul.mubr.msk.bf16.vlgmr.msra.gmra.mrb[12].mxu0 %vm164_vm4, %v623_v19 }
 0x9f9   :  { %1865 = vmatpush3.bf16.msra.mxu0 %v2189_v14  ;;  %1872 = vmatprep.mubr.msk.bf16.mxu0 %vm2106_vm3, %v2105_v12 }
 0x9fa   :  { %1866 = vmatprep.subr.bf16.mxu0 %v2105_v12 }
 0x9fd   :  { %1867 = vmatpush3.bf16.msra.mxu0 %v2205_v17 }
 0x9fe   :  { %1868 = vmatprep.subr.bf16.mxu0 %v2105_v12 }
 0xa01   :  { %1869 = vmatpush3.bf16.msra.mxu0 %v2221_v22 }
 0xa02   :  { %1870 = vmatprep.subr.bf16.mxu0 %v2105_v12 }
 0xa05   :  { %1871 = vmatpush3.bf16.msra.mxu0 %v2229_v23 }
 0xa06   :  { %1882 = vmatprep.subr.bf16.mxu0 %v2105_v12 }
 0xacb   :  { %v661_v21 = vpop.f32.mrb[12].mxu0 }
 0xacc   :  { %v662_v25 = vadd.f32 %v2285_v54, %v661_v21  ;;  %v1852_v27 = vpop.f32.mrb[13].mxu0 }
 0xacd   :  { %v664_v29 = vpop.f32.mrb[14].mxu0 }
 0xace   :  { %v667_v30 = vmul.f32 %v1642_v20, %v662_v25  ;;  %v1853_v31 = vpop.f32.mrb[15].mxu0 }
 0xad0   :  { %v672_v33 = vsel %vm82_vm2, %v667_v30, %v670_v32 }
 0xad1   :  { %v673_v34 = vpack.c.bf16 %v672_v33, %v672_v33 }
 0xad3   :  { %1861 = vmatmul.mubr.msk.bf16.vlgmr.msra.gmra.mrb[24].mxu1 %vm324_vm5, %v673_v34 }
 0xad4   :  { %1877 = vmatpush3.bf16.msra.mxu1 %v2179_v9  ;;  %1878 = vmatprep.mubr.msk.bf16.mxu1 %vm2106_vm3, %v2105_v12 }
 0xad5   :  { %1892 = vmatprep.subr.bf16.mxu1 %v2105_v12 }
 0xba6   :  { %v711_v35 = vpop.f32.mrb[24].mxu1 }
 0xba7   :  { %v712_v36 = vadd.f32 %v2300_v0, %v711_v35  ;;  %v1862_v37 = vpop.f32.mrb[25].mxu1 }
 0xba8   :  { %v714_v38 = vpop.f32.mrb[26].mxu1 }
 0xba9   :  { %2042 = vtanh.f32 %v712_v36  ;;  %v1863_v39 = vpop.f32.mrb[27].mxu1  ;;  %v1645_v41 = vmul.f32 -1.442695, %v712_v36 }
 0xbab   :  { %2044 = vpow2.f32 %v1645_v41 }
 0xbb3   :  { %v2043_v40 = vpop.eup %2042 }
 0xbb4   :  { %726 = vrot.lane.b32.xlu0 %v2043_v40, %s2108_s23 }
 0xbb5   :  { %v2045_v42 = vpop.eup %2044 }
 0xbb6   :  { %v720_v43 = vadd.f32 1.0, %v2045_v42  ;;  %v922_v42 = vld [vmem:[#allocation2 + $0x20] sm:$0xff] }
 0xbb8   :  { %2046 = vrcp.f32 %v720_v43 }
 0xbc2   :  { %v2047_v44 = vpop.eup %2046 }
 0xbc3   :  { %v724_v47 = vmul.f32 %v2047_v44, %v572_v6 }
 0xc26   :  { %v727_v45 = vpop.permute.xlu0 %726 }
 0xc27   :  { %v729_v46 = vmul.f32 %v2047_v44, %v727_v45 }
 0xc29   :  { %731 = vrot.lane.b32.xlu1 %v729_v46, %s2108_s23 }
 0xc9b   :  { %v732_v48 = vpop.permute.xlu1 %731 }
 0xc9c   :  { %v734_v49 = vadd.f32 %v732_v48, %v724_v47 }
 0xc9e   :  { %2048 = vtanh.f32 %v734_v49 }
 0xca8   :  { %v2049_v50 = vpop.eup %2048 }
 0xca9   :  { %737 = vrot.lane.b32.xlu0 %v2049_v50, %s2108_s23  ;;  %v1654_v50 = vld [vmem:[%s2612_s0 + $0x20] sm:$0xff] }
 0xd1b   :  { %v738_v51 = vpop.permute.xlu0 %737 }
 0xd1c   :  { %v740_v52 = vmul.f32 %v2047_v44, %v738_v51 }
 0xd1e   :  { %742 = vrot.lane.b32.xlu1 %v740_v52, %s2109_s8 }
 0xd90   :  { %v743_v53 = vpop.permute.xlu1 %742 }
 0xd91   :  { %v745_v55 = vsel %vm399_vm6, %v743_v53, %v734_v49 }
 0xd92   :  { %1646 = vst.msk [vmem:[%s2614_s9 + $0x10] sm:$0xff] %vm205_vm7, %v745_v55  ;;  %v748_v56 = vpack.c.bf16 %v745_v55, %v745_v55  ;;  %842 = vrot.lane.b32.xlu0 %v745_v55, %s2110_s26 }
 0xd94   :  { %1873 = vmatmul.mubr.msk.bf16.vlgmr.msra.gmra.mrb[16].mxu0 %vm205_vm7, %v748_v56 }
 0xd95   :  { %1883 = vmatpush3.bf16.msra.mxu0 %v2237_v24  ;;  %1888 = vmatprep.mubr.msk.bf16.mxu0 %vm2106_vm3, %v2105_v12 }
 0xd96   :  { %1884 = vmatprep.subr.bf16.mxu0 %v2105_v12 }
 0xd99   :  { %1885 = vmatpush3.bf16.msra.mxu0 %v2244_v26 }
 0xd9a   :  { %1886 = vmatprep.subr.bf16.mxu0 %v2105_v12 }
 0xd9d   :  { %1887 = vmatpush3.bf16.msra.mxu0 %v2255_v28 }
 0xd9e   :  { %1904 = vmatprep.subr.bf16.mxu0 %v2105_v12 }
 0xe04   :  { %v843_v10 = vpop.permute.xlu0 %842 }
 0xe67   :  { %v787_v58 = vpop.f32.mrb[16].mxu0 }
 0xe68   :  { %v788_v59 = vadd.f32 %v787_v58, %v749_v57  ;;  %v1874_v60 = vpop.f32.mrb[17].mxu0 }
 0xe69   :  { %v790_v61 = vpop.f32.mrb[18].mxu0 }
 0xe6a   :  { %2050 = vtanh.f32 %v788_v59  ;;  %v1875_v62 = vpop.f32.mrb[19].mxu0 }
 0xe74   :  { %v2051_v63 = vpop.eup %2050 }
 0xe75   :  { %v796_v1 = vpack.c.bf16 %v2051_v63, %v2051_v63 }
 0xe77   :  { %1879 = vmatmul.mubr.msk.bf16.vlgmr.msra.gmra.mrb[28].mxu1 %vm164_vm4, %v796_v1 }
 0xe78   :  { %1893 = vmatpush3.bf16.msra.mxu1 %v2189_v14  ;;  %1900 = vmatprep.mubr.msk.bf16.mxu1 %vm2106_vm3, %v2105_v12 }
 0xe79   :  { %1894 = vmatprep.subr.bf16.mxu1 %v2105_v12 }
 0xe7c   :  { %1895 = vmatpush3.bf16.msra.mxu1 %v2205_v17 }
 0xe7d   :  { %1896 = vmatprep.subr.bf16.mxu1 %v2105_v12 }
 0xe80   :  { %1897 = vmatpush3.bf16.msra.mxu1 %v2221_v22 }
 0xe81   :  { %1898 = vmatprep.subr.bf16.mxu1 %v2105_v12 }
 0xe84   :  { %1899 = vmatpush3.bf16.msra.mxu1 %v2229_v23 }
 0xe85   :  { %1910 = vmatprep.subr.bf16.mxu1 %v2105_v12 }
 0xf4a   :  { %v834_v3 = vpop.f32.mrb[28].mxu1 }
 0xf4b   :  { %v835_v4 = vadd.f32 %v2285_v54, %v834_v3  ;;  %v1880_v5 = vpop.f32.mrb[29].mxu1 }
 0xf4c   :  { %v837_v6 = vpop.f32.mrb[30].mxu1 }
 0xf4d   :  { %v840_v7 = vmul.f32 %v1648_v2, %v835_v4  ;;  %v1881_v8 = vpop.f32.mrb[31].mxu1 }
 0xf4f   :  { %v845_v11 = vsel %vm82_vm2, %v840_v7, %v843_v10 }
 0xf50   :  { %v846_v13 = vpack.c.bf16 %v845_v11, %v845_v11 }
 0xf52   :  { %1889 = vmatmul.mubr.msk.bf16.vlgmr.msra.gmra.mrb[20].mxu0 %vm324_vm5, %v846_v13 }
 0xf53   :  { %1905 = vmatpush3.bf16.msra.mxu0 %v2179_v9  ;;  %1906 = vmatprep.mubr.msk.bf16.mxu0 %vm2106_vm3, %v2105_v12 }
 0xf54   :  { %1920 = vmatprep.subr.bf16.mxu0 %v2105_v12 }
0x1025   :  { %v884_v15 = vpop.f32.mrb[20].mxu0 }
0x1026   :  { %v885_v16 = vadd.f32 %v2300_v0, %v884_v15  ;;  %v1890_v18 = vpop.f32.mrb[21].mxu0 }
0x1027   :  { %v887_v19 = vpop.f32.mrb[22].mxu0 }
0x1028   :  { %2052 = vtanh.f32 %v885_v16  ;;  %v1891_v20 = vpop.f32.mrb[23].mxu0  ;;  %v1651_v25 = vmul.f32 -1.442695, %v885_v16 }
0x102a   :  { %2054 = vpow2.f32 %v1651_v25 }
0x1032   :  { %v2053_v21 = vpop.eup %2052 }
0x1033   :  { %899 = vrot.lane.b32.xlu1 %v2053_v21, %s2108_s23 }
0x1034   :  { %v2055_v27 = vpop.eup %2054 }
0x1035   :  { %v893_v29 = vadd.f32 1.0, %v2055_v27  ;;  %v1095_v27 = vld [vmem:[#allocation2 + $0x28] sm:$0xff] }
0x1037   :  { %2056 = vrcp.f32 %v893_v29 }
0x1041   :  { %v2057_v30 = vpop.eup %2056 }
0x1042   :  { %v897_v33 = vmul.f32 %v2057_v30, %v745_v55 }
0x10a5   :  { %v900_v31 = vpop.permute.xlu1 %899 }
0x10a6   :  { %v902_v32 = vmul.f32 %v2057_v30, %v900_v31 }
0x10a8   :  { %904 = vrot.lane.b32.xlu0 %v902_v32, %s2108_s23 }
0x111a   :  { %v905_v34 = vpop.permute.xlu0 %904 }
0x111b   :  { %v907_v35 = vadd.f32 %v905_v34, %v897_v33 }
0x111d   :  { %2058 = vtanh.f32 %v907_v35 }
0x1127   :  { %v2059_v36 = vpop.eup %2058 }
0x1128   :  { %910 = vrot.lane.b32.xlu1 %v2059_v36, %s2108_s23 }
0x119a   :  { %v911_v37 = vpop.permute.xlu1 %910 }
0x119b   :  { %v913_v38 = vmul.f32 %v2057_v30, %v911_v37 }
0x119d   :  { %915 = vrot.lane.b32.xlu0 %v913_v38, %s2109_s8 }
0x120f   :  { %v916_v39 = vpop.permute.xlu0 %915 }
0x1210   :  { %v918_v40 = vsel %vm399_vm6, %v916_v39, %v907_v35 }
0x1211   :  { %1652 = vst.msk [vmem:[%s2614_s9 + $0x18] sm:$0xff] %vm205_vm7, %v918_v40  ;;  %v921_v41 = vpack.c.bf16 %v918_v40, %v918_v40  ;;  %1015 = vrot.lane.b32.xlu1 %v918_v40, %s2110_s26 }
0x1213   :  { %1901 = vmatmul.mubr.msk.bf16.vlgmr.msra.gmra.mrb[32].mxu1 %vm205_vm7, %v921_v41 }
0x1214   :  { %1911 = vmatpush3.bf16.msra.mxu1 %v2237_v24  ;;  %1916 = vmatprep.mubr.msk.bf16.mxu1 %vm2106_vm3, %v2105_v12 }
0x1215   :  { %1912 = vmatprep.subr.bf16.mxu1 %v2105_v12 }
0x1218   :  { %1913 = vmatpush3.bf16.msra.mxu1 %v2244_v26 }
0x1219   :  { %1914 = vmatprep.subr.bf16.mxu1 %v2105_v12 }
0x121c   :  { %1915 = vmatpush3.bf16.msra.mxu1 %v2255_v28 }
0x121d   :  { %1932 = vmatprep.subr.bf16.mxu1 %v2105_v12 }
0x1283   :  { %v1016_v58 = vpop.permute.xlu1 %1015 }
0x12e6   :  { %v960_v43 = vpop.f32.mrb[32].mxu1 }
0x12e7   :  { %v961_v44 = vadd.f32 %v960_v43, %v922_v42  ;;  %v1902_v45 = vpop.f32.mrb[33].mxu1 }
0x12e8   :  { %v963_v46 = vpop.f32.mrb[34].mxu1 }
0x12e9   :  { %2060 = vtanh.f32 %v961_v44  ;;  %v1903_v47 = vpop.f32.mrb[35].mxu1 }
0x12f3   :  { %v2061_v48 = vpop.eup %2060 }
0x12f4   :  { %v969_v49 = vpack.c.bf16 %v2061_v48, %v2061_v48 }
0x12f6   :  { %1907 = vmatmul.mubr.msk.bf16.vlgmr.msra.gmra.mrb[24].mxu0 %vm164_vm4, %v969_v49 }
0x12f7   :  { %1921 = vmatpush3.bf16.msra.mxu0 %v2189_v14  ;;  %1928 = vmatprep.mubr.msk.bf16.mxu0 %vm2106_vm3, %v2105_v12 }
0x12f8   :  { %1922 = vmatprep.subr.bf16.mxu0 %v2105_v12 }
0x12fb   :  { %1923 = vmatpush3.bf16.msra.mxu0 %v2205_v17 }
0x12fc   :  { %1924 = vmatprep.subr.bf16.mxu0 %v2105_v12 }
0x12ff   :  { %1925 = vmatpush3.bf16.msra.mxu0 %v2221_v22 }
0x1300   :  { %1926 = vmatprep.subr.bf16.mxu0 %v2105_v12 }
0x1303   :  { %1927 = vmatpush3.bf16.msra.mxu0 %v2229_v23 }
0x1304   :  { %1938 = vmatprep.subr.bf16.mxu0 %v2105_v12 }
0x13c9   :  { %v1007_v51 = vpop.f32.mrb[24].mxu0 }
0x13ca   :  { %v1008_v52 = vadd.f32 %v2285_v54, %v1007_v51  ;;  %v1908_v53 = vpop.f32.mrb[25].mxu0 }
0x13cb   :  { %v1010_v55 = vpop.f32.mrb[26].mxu0 }
0x13cc   :  { %v1013_v56 = vmul.f32 %v1654_v50, %v1008_v52  ;;  %v1909_v57 = vpop.f32.mrb[27].mxu0 }
0x13ce   :  { %v1018_v59 = vsel %vm82_vm2, %v1013_v56, %v1016_v58 }
0x13cf   :  { %v1019_v60 = vpack.c.bf16 %v1018_v59, %v1018_v59 }
0x13d1   :  { %1917 = vmatmul.mubr.msk.bf16.vlgmr.msra.gmra.mrb[36].mxu1 %vm324_vm5, %v1019_v60 }
0x13d2   :  { %1933 = vmatpush3.bf16.msra.mxu1 %v2179_v9  ;;  %1934 = vmatprep.mubr.msk.bf16.mxu1 %vm2106_vm3, %v2105_v12 }
0x13d3   :  { %1948 = vmatprep.subr.bf16.mxu1 %v2105_v12 }
0x14a4   :  { %v1057_v61 = vpop.f32.mrb[36].mxu1 }
0x14a5   :  { %v1058_v62 = vadd.f32 %v2300_v0, %v1057_v61  ;;  %v1918_v63 = vpop.f32.mrb[37].mxu1 }
0x14a6   :  { %v1060_v1 = vpop.f32.mrb[38].mxu1 }
0x14a7   :  { %2062 = vtanh.f32 %v1058_v62  ;;  %v1919_v2 = vpop.f32.mrb[39].mxu1  ;;  %v1657_v4 = vmul.f32 -1.442695, %v1058_v62 }
0x14a9   :  { %2064 = vpow2.f32 %v1657_v4 }
0x14b1   :  { %v2063_v3 = vpop.eup %2062 }
0x14b2   :  { %1072 = vrot.lane.b32.xlu0 %v2063_v3, %s2108_s23  ;;  %v1268_v3 = vld [vmem:[#allocation2 + $0x30] sm:$0xff] }
0x14b3   :  { %v2065_v5 = vpop.eup %2064 }
0x14b4   :  { %v1066_v6 = vadd.f32 1.0, %v2065_v5 }
0x14b6   :  { %2066 = vrcp.f32 %v1066_v6 }
0x14c0   :  { %v2067_v7 = vpop.eup %2066 }
0x14c1   :  { %v1070_v11 = vmul.f32 %v2067_v7, %v918_v40 }
0x1524   :  { %v1073_v8 = vpop.permute.xlu0 %1072 }
0x1525   :  { %v1075_v10 = vmul.f32 %v2067_v7, %v1073_v8 }
0x1527   :  { %1077 = vrot.lane.b32.xlu1 %v1075_v10, %s2108_s23 }
0x1599   :  { %v1078_v13 = vpop.permute.xlu1 %1077 }
0x159a   :  { %v1080_v15 = vadd.f32 %v1078_v13, %v1070_v11  ;;  %v2101_v11 = vld [vmem:[%s2609_s3 + $0x8] sm:$0xff]   ;;  %v1666_v13 = vld [vmem:[%s2612_s0 + $0x30] sm:$0xff] }
0x159c   :  { %2068 = vtanh.f32 %v1080_v15 }
0x15a6   :  { %v2069_v16 = vpop.eup %2068 }
0x15a7   :  { %1083 = vrot.lane.b32.xlu0 %v2069_v16, %s2108_s23 }
0x1619   :  { %v1084_v18 = vpop.permute.xlu0 %1083 }
0x161a   :  { %v1086_v19 = vmul.f32 %v2067_v7, %v1084_v18 }
0x161c   :  { %1088 = vrot.lane.b32.xlu1 %v1086_v19, %s2109_s8 }
0x168e   :  { %v1089_v20 = vpop.permute.xlu1 %1088 }
0x168f   :  { %v1091_v21 = vsel %vm399_vm6, %v1089_v20, %v1080_v15 }
0x1690   :  { %1658 = vst.msk [vmem:[%s2614_s9 + $0x20] sm:$0xff] %vm205_vm7, %v1091_v21  ;;  %v1094_v25 = vpack.c.bf16 %v1091_v21, %v1091_v21  ;;  %1188 = vrot.lane.b32.xlu0 %v1091_v21, %s2110_s26 }
0x1692   :  { %1929 = vmatmul.mubr.msk.bf16.vlgmr.msra.gmra.mrb[28].mxu0 %vm205_vm7, %v1094_v25 }
0x1693   :  { %1939 = vmatpush3.bf16.msra.mxu0 %v2237_v24  ;;  %1944 = vmatprep.mubr.msk.bf16.mxu0 %vm2106_vm3, %v2105_v12 }
0x1694   :  { %1940 = vmatprep.subr.bf16.mxu0 %v2105_v12 }
0x1697   :  { %1941 = vmatpush3.bf16.msra.mxu0 %v2244_v26 }
0x1698   :  { %1942 = vmatprep.subr.bf16.mxu0 %v2105_v12 }
0x169b   :  { %1943 = vmatpush3.bf16.msra.mxu0 %v2255_v28 }
0x169c   :  { %1960 = vmatprep.subr.bf16.mxu0 %v2105_v12 }
0x1702   :  { %v1189_v41 = vpop.permute.xlu0 %1188 }
0x1765   :  { %v1133_v29 = vpop.f32.mrb[28].mxu0 }
0x1766   :  { %v1134_v30 = vadd.f32 %v1133_v29, %v1095_v27  ;;  %v1930_v31 = vpop.f32.mrb[29].mxu0 }
0x1767   :  { %v1136_v32 = vpop.f32.mrb[30].mxu0 }
0x1768   :  { %2070 = vtanh.f32 %v1134_v30  ;;  %v1931_v33 = vpop.f32.mrb[31].mxu0 }
0x1772   :  { %v2071_v34 = vpop.eup %2070 }
0x1773   :  { %v1142_v35 = vpack.c.bf16 %v2071_v34, %v2071_v34 }
0x1775   :  { %1935 = vmatmul.mubr.msk.bf16.vlgmr.msra.gmra.mrb[40].mxu1 %vm164_vm4, %v1142_v35 }
0x1776   :  { %1949 = vmatpush3.bf16.msra.mxu1 %v2189_v14  ;;  %1956 = vmatprep.mubr.msk.bf16.mxu1 %vm2106_vm3, %v2105_v12  ;;  %v1660_v14 = vld [vmem:[%s2612_s0 + $0x28] sm:$0xff] }
0x1777   :  { %1950 = vmatprep.subr.bf16.mxu1 %v2105_v12 }
0x177a   :  { %1951 = vmatpush3.bf16.msra.mxu1 %v2205_v17 }
0x177b   :  { %1952 = vmatprep.subr.bf16.mxu1 %v2105_v12 }
0x177e   :  { %1953 = vmatpush3.bf16.msra.mxu1 %v2221_v22 }
0x177f   :  { %1954 = vmatprep.subr.bf16.mxu1 %v2105_v12 }
0x1782   :  { %1955 = vmatpush3.bf16.msra.mxu1 %v2229_v23 }
0x1783   :  { %1966 = vmatprep.subr.bf16.mxu1 %v2105_v12 }
0x1848   :  { %v1180_v36 = vpop.f32.mrb[40].mxu1 }
0x1849   :  { %v1181_v37 = vadd.f32 %v2285_v54, %v1180_v36  ;;  %v1936_v38 = vpop.f32.mrb[41].mxu1 }
0x184a   :  { %v1183_v39 = vpop.f32.mrb[42].mxu1 }
0x184b   :  { %v1186_v17 = vmul.f32 %v1660_v14, %v1181_v37  ;;  %v1937_v40 = vpop.f32.mrb[43].mxu1 }
0x184d   :  { %v1191_v42 = vsel %vm82_vm2, %v1186_v17, %v1189_v41 }
0x184e   :  { %v1192_v43 = vpack.c.bf16 %v1191_v42, %v1191_v42 }
0x1850   :  { %1945 = vmatmul.mubr.msk.bf16.vlgmr.msra.gmra.mrb[32].mxu0 %vm324_vm5, %v1192_v43 }
0x1851   :  { %1961 = vmatpush3.bf16.msra.mxu0 %v2179_v9  ;;  %1962 = vmatprep.mubr.msk.bf16.mxu0 %vm2106_vm3, %v2105_v12 }
0x1852   :  { %1976 = vmatprep.subr.bf16.mxu0 %v2105_v12 }
0x1923   :  { %v1230_v44 = vpop.f32.mrb[32].mxu0 }
0x1924   :  { %v1231_v45 = vadd.f32 %v2300_v0, %v1230_v44  ;;  %v1946_v46 = vpop.f32.mrb[33].mxu0 }
0x1925   :  { %v1233_v47 = vpop.f32.mrb[34].mxu0  ;;  %v2102_v46 = vld [vmem:[%s2607_s7] sm:$0xff]  }
0x1926   :  { %2072 = vtanh.f32 %v1231_v45  ;;  %v1947_v48 = vpop.f32.mrb[35].mxu0  ;;  %v1663_v50 = vmul.f32 -1.442695, %v1231_v45  ;;  %v2103_v47 = vld [vmem:[%s2607_s7 + $0x8] sm:$0xff]  }
0x1927   :  { %v1441_v48 = vld [vmem:[#allocation2 + $0x38] sm:$0xff] }
0x1928   :  { %2074 = vpow2.f32 %v1663_v50 }
0x1930   :  { %v2073_v49 = vpop.eup %2072 }
0x1931   :  { %1245 = vrot.lane.b32.xlu1 %v2073_v49, %s2108_s23 }
0x1932   :  { %v2075_v51 = vpop.eup %2074 }
0x1933   :  { %v1239_v52 = vadd.f32 1.0, %v2075_v51 }
0x1935   :  { %2076 = vrcp.f32 %v1239_v52 }
0x193f   :  { %v2077_v53 = vpop.eup %2076 }
0x1940   :  { %v1243_v57 = vmul.f32 %v2077_v53, %v1091_v21 }
0x19a3   :  { %v1246_v55 = vpop.permute.xlu1 %1245 }
0x19a4   :  { %v1248_v56 = vmul.f32 %v2077_v53, %v1246_v55 }
0x19a6   :  { %1250 = vrot.lane.b32.xlu0 %v1248_v56, %s2108_s23 }
0x1a18   :  { %v1251_v58 = vpop.permute.xlu0 %1250 }
0x1a19   :  { %v1253_v59 = vadd.f32 %v1251_v58, %v1243_v57  ;;  %v1672_v57 = vld [vmem:[%s2612_s0 + $0x38] sm:$0xff] }
0x1a1b   :  { %2078 = vtanh.f32 %v1253_v59 }
0x1a25   :  { %v2079_v60 = vpop.eup %2078 }
0x1a26   :  { %1256 = vrot.lane.b32.xlu1 %v2079_v60, %s2108_s23 }
0x1a98   :  { %v1257_v61 = vpop.permute.xlu1 %1256 }
0x1a99   :  { %v1259_v62 = vmul.f32 %v2077_v53, %v1257_v61 }
0x1a9b   :  { %1261 = vrot.lane.b32.xlu0 %v1259_v62, %s2109_s8 }
0x1b0d   :  { %v1262_v63 = vpop.permute.xlu0 %1261 }
0x1b0e   :  { %v2520_v1 = vsel %vm399_vm6, %v1262_v63, %v1253_v59 }
0x1b0f   :  { %1664 = vst.msk [vmem:[%s2614_s9 + $0x28] sm:$0xff] %vm205_vm7, %v2520_v1  ;;  %v1267_v2 = vpack.c.bf16 %v2520_v1, %v2520_v1  ;;  %1361 = vrot.lane.b32.xlu1 %v2520_v1, %s2110_s26 }
0x1b11   :  { %1957 = vmatmul.mubr.msk.bf16.vlgmr.msra.gmra.mrb[44].mxu1 %vm205_vm7, %v1267_v2 }
0x1b12   :  { %1967 = vmatpush3.bf16.msra.mxu1 %v2237_v24  ;;  %1972 = vmatprep.mubr.msk.bf16.mxu1 %vm2106_vm3, %v2105_v12 }
0x1b13   :  { %1968 = vmatprep.subr.bf16.mxu1 %v2105_v12 }
0x1b16   :  { %1969 = vmatpush3.bf16.msra.mxu1 %v2244_v26  ;;  %v2100_v26 = vld [vmem:[%s2609_s3] sm:$0xff]  }
0x1b17   :  { %1970 = vmatprep.subr.bf16.mxu1 %v2105_v12 }
0x1b1a   :  { %1971 = vmatpush3.bf16.msra.mxu1 %v2255_v28 }
0x1b1b   :  { %1988 = vmatprep.subr.bf16.mxu1 %v2105_v12 }
0x1b81   :  { %v1362_v25 = vpop.permute.xlu1 %1361 }
0x1be4   :  { %v1306_v4 = vpop.f32.mrb[44].mxu1 }
0x1be5   :  { %v1307_v5 = vadd.f32 %v1306_v4, %v1268_v3  ;;  %v1958_v6 = vpop.f32.mrb[45].mxu1 }
0x1be6   :  { %v1309_v7 = vpop.f32.mrb[46].mxu1 }
0x1be7   :  { %2080 = vtanh.f32 %v1307_v5  ;;  %v1959_v24 = vpop.f32.mrb[47].mxu1 }
0x1bf1   :  { %v2081_v8 = vpop.eup %2080 }
0x1bf2   :  { %v1315_v10 = vpack.c.bf16 %v2081_v8, %v2081_v8 }
0x1bf4   :  { %1963 = vmatmul.mubr.msk.bf16.vlgmr.msra.gmra.mrb[36].mxu0 %vm164_vm4, %v1315_v10 }
0x1bf5   :  { %1977 = vmatpush3.bf16.msra.mxu0 %v2100_v26  ;;  %1984 = vmatprep.mubr.msk.bf16.mxu0 %vm2106_vm3, %v2105_v12 }
0x1bf6   :  { %1978 = vmatprep.subr.bf16.mxu0 %v2105_v12 }
0x1bf9   :  { %1979 = vmatpush3.bf16.msra.mxu0 %v2101_v11 }
0x1bfa   :  { %1980 = vmatprep.subr.bf16.mxu0 %v2105_v12 }
0x1bfd   :  { %1981 = vmatpush3.bf16.msra.mxu0 %v2221_v22 }
0x1bfe   :  { %1982 = vmatprep.subr.bf16.mxu0 %v2105_v12 }
0x1c01   :  { %1983 = vmatpush3.bf16.msra.mxu0 %v2229_v23 }
0x1c02   :  { %1994 = vmatprep.subr.bf16.mxu0 %v2105_v12 }
0x1cc7   :  { %v1353_v15 = vpop.f32.mrb[36].mxu0 }
0x1cc8   :  { %v1354_v16 = vadd.f32 %v2285_v54, %v1353_v15  ;;  %v1964_v18 = vpop.f32.mrb[37].mxu0 }
0x1cc9   :  { %v1356_v19 = vpop.f32.mrb[38].mxu0 }
0x1cca   :  { %v1359_v20 = vmul.f32 %v1666_v13, %v1354_v16  ;;  %v1965_v21 = vpop.f32.mrb[39].mxu0 }
0x1ccc   :  { %v1364_v22 = vsel %vm82_vm2, %v1359_v20, %v1362_v25 }
0x1ccd   :  { %v1365_v27 = vpack.c.bf16 %v1364_v22, %v1364_v22 }
0x1ccf   :  { %1973 = vmatmul.mubr.msk.bf16.vlgmr.msra.gmra.mrb[48].mxu1 %vm324_vm5, %v1365_v27 }
0x1cd0   :  { %1989 = vmatpush3.bf16.msra.mxu1 %v2179_v9  ;;  %1990 = vmatprep.mubr.msk.bf16.mxu1 %vm2106_vm3, %v2105_v12 }
0x1da2   :  { %v1403_v23 = vpop.f32.mrb[48].mxu1 }
0x1da3   :  { %v1404_v29 = vadd.f32 %v2300_v0, %v1403_v23  ;;  %v1974_v30 = vpop.f32.mrb[49].mxu1 }
0x1da4   :  { %v1406_v31 = vpop.f32.mrb[50].mxu1 }
0x1da5   :  { %2082 = vtanh.f32 %v1404_v29  ;;  %v1975_v32 = vpop.f32.mrb[51].mxu1  ;;  %v1669_v34 = vmul.f32 -1.442695, %v1404_v29 }
0x1da7   :  { %2084 = vpow2.f32 %v1669_v34 }
0x1daf   :  { %v2083_v33 = vpop.eup %2082 }
0x1db0   :  { %1418 = vrot.lane.b32.xlu0 %v2083_v33, %s2108_s23 }
0x1db1   :  { %v2085_v35 = vpop.eup %2084 }
0x1db2   :  { %v1412_v14 = vadd.f32 1.0, %v2085_v35 }
0x1db4   :  { %2086 = vrcp.f32 %v1412_v14 }
0x1dbe   :  { %v2087_v36 = vpop.eup %2086 }
0x1dbf   :  { %v1416_v38 = vmul.f32 %v2087_v36, %v2520_v1 }
0x1e22   :  { %v1419_v9 = vpop.permute.xlu0 %1418 }
0x1e23   :  { %v1421_v37 = vmul.f32 %v2087_v36, %v1419_v9 }
0x1e25   :  { %1423 = vrot.lane.b32.xlu1 %v1421_v37, %s2108_s23 }
0x1e97   :  { %v1424_v39 = vpop.permute.xlu1 %1423 }
0x1e98   :  { %v1426_v17 = vadd.f32 %v1424_v39, %v1416_v38 }
0x1e9a   :  { %2088 = vtanh.f32 %v1426_v17 }
0x1ea4   :  { %v2089_v40 = vpop.eup %2088 }
0x1ea5   :  { %1429 = vrot.lane.b32.xlu0 %v2089_v40, %s2108_s23 }
0x1f17   :  { %v1430_v41 = vpop.permute.xlu0 %1429 }
0x1f18   :  { %v1432_v42 = vmul.f32 %v2087_v36, %v1430_v41 }
0x1f1a   :  { %1434 = vrot.lane.b32.xlu1 %v1432_v42, %s2109_s8 }
0x1f8c   :  { %v1435_v43 = vpop.permute.xlu1 %1434 }
0x1f8d   :  { %v1437_v44 = vsel %vm399_vm6, %v1435_v43, %v1426_v17 }
0x1f8e   :  { %1670 = vst.msk [vmem:[%s2614_s9 + $0x30] sm:$0xff] %vm205_vm7, %v1437_v44  ;;  %v1440_v45 = vpack.c.bf16 %v1437_v44, %v1437_v44  ;;  %1534 = vrot.lane.b32.xlu0 %v1437_v44, %s2110_s26 }
0x1f90   :  { %1985 = vmatmul.mubr.msk.bf16.vlgmr.msra.gmra.mrb[40].mxu0 %vm205_vm7, %v1440_v45 }
0x1f91   :  { %1995 = vmatpush3.bf16.msra.mxu0 %v2102_v46  ;;  %2000 = vmatprep.mubr.msk.bf16.mxu0 %vm2106_vm3, %v2105_v12 }
0x1f92   :  { %1996 = vmatprep.subr.bf16.mxu0 %v2105_v12 }
0x1f95   :  { %1997 = vmatpush3.bf16.msra.mxu0 %v2103_v47 }
0x1f96   :  { %1998 = vmatprep.subr.bf16.mxu0 %v2105_v12 }
0x1f99   :  { %1999 = vmatpush3.bf16.msra.mxu0 %v2255_v28 }
0x2000   :  { %v1535_v62 = vpop.permute.xlu0 %1534 }
0x2063   :  { %v1479_v49 = vpop.f32.mrb[40].mxu0 }
0x2064   :  { %v1480_v50 = vadd.f32 %v1479_v49, %v1441_v48  ;;  %v1986_v51 = vpop.f32.mrb[41].mxu0 }
0x2065   :  { %v1482_v52 = vpop.f32.mrb[42].mxu0 }
0x2066   :  { %2090 = vtanh.f32 %v1480_v50  ;;  %v1987_v53 = vpop.f32.mrb[43].mxu0 }
0x2070   :  { %v2091_v55 = vpop.eup %2090 }
0x2071   :  { %v1488_v56 = vpack.c.bf16 %v2091_v55, %v2091_v55 }
0x2073   :  { %1991 = vmatmul.mubr.msk.bf16.vlgmr.msra.gmra.mrb[52].mxu1 %vm164_vm4, %v1488_v56 }
0x2146   :  { %v1526_v58 = vpop.f32.mrb[52].mxu1 }
0x2147   :  { %v1527_v12 = vadd.f32 %v2285_v54, %v1526_v58  ;;  %v1992_v59 = vpop.f32.mrb[53].mxu1 }
0x2148   :  { %v1529_v28 = vpop.f32.mrb[54].mxu1 }
0x2149   :  { %v1532_v60 = vmul.f32 %v1672_v57, %v1527_v12  ;;  %v1993_v61 = vpop.f32.mrb[55].mxu1 }
0x214b   :  { %v1537_v63 = vsel %vm82_vm2, %v1532_v60, %v1535_v62 }
0x214c   :  { %v1538_v1 = vpack.c.bf16 %v1537_v63, %v1537_v63 }
0x214e   :  { %2001 = vmatmul.mubr.msk.bf16.vlgmr.msra.gmra.mrb[44].mxu0 %vm324_vm5, %v1538_v1 }
0x2221   :  { %v1576_v2 = vpop.f32.mrb[44].mxu0 }
0x2222   :  { %v1577_v3 = vadd.f32 %v2300_v0, %v1576_v2  ;;  %v2002_v4 = vpop.f32.mrb[45].mxu0 }
0x2223   :  { %v1579_v5 = vpop.f32.mrb[46].mxu0 }
0x2224   :  { %2092 = vtanh.f32 %v1577_v3  ;;  %v2003_v6 = vpop.f32.mrb[47].mxu0  ;;  %v1675_v54 = vmul.f32 -1.442695, %v1577_v3 }
0x2226   :  { %2094 = vpow2.f32 %v1675_v54 }
0x222e   :  { %v2093_v7 = vpop.eup %2092 }
0x222f   :  { %1591 = vrot.lane.b32.xlu1 %v2093_v7, %s2108_s23 }
0x2230   :  { %v2095_v24 = vpop.eup %2094 }
0x2231   :  { %v1585_v8 = vadd.f32 1.0, %v2095_v24 }
0x2233   :  { %2096 = vrcp.f32 %v1585_v8 }
0x223d   :  { %v2097_v10 = vpop.eup %2096 }
0x223e   :  { %v1589_v13 = vmul.f32 %v2097_v10, %v1437_v44 }
0x22a1   :  { %v1592_v26 = vpop.permute.xlu1 %1591 }
0x22a2   :  { %v1594_v11 = vmul.f32 %v2097_v10, %v1592_v26 }
0x22a4   :  { %1596 = vrot.lane.b32.xlu0 %v1594_v11, %s2108_s23 }
0x2316   :  { %v1597_v15 = vpop.permute.xlu0 %1596 }
0x2317   :  { %v1599_v0 = vadd.f32 %v1597_v15, %v1589_v13 }
0x2319   :  { %2098 = vtanh.f32 %v1599_v0 }
0x2323   :  { %v2099_v16 = vpop.eup %2098 }
0x2324   :  { %1602 = vrot.lane.b32.xlu1 %v2099_v16, %s2108_s23 }
0x2396   :  { %v1603_v18 = vpop.permute.xlu1 %1602 }
0x2397   :  { %v1605_v19 = vmul.f32 %v2097_v10, %v1603_v18 }
0x2399   :  { %1607 = vrot.lane.b32.xlu0 %v1605_v19, %s2109_s8 }
0x240b   :  { %v1608_v20 = vpop.permute.xlu0 %1607 }
0x240c   :  { %v1610_v21 = vsel %vm399_vm6, %v1608_v20, %v1599_v0 }
0x240d   :  { %1676 = vst.msk [vmem:[%s2614_s9 + $0x38] sm:$0xff] %vm205_vm7, %v1610_v21 }

</bundles_post_ra>
